<compile_context>
chip_gen: v7x
topology: tpu7x:2x2x1
jax: 0.10.0
libtpu: 0.0.40
codegen_flags: <defaults>
</compile_context>

<pallas_src>
import functools

import jax
import jax.numpy as jnp
from jax.experimental import pallas as pl
from jax.experimental.pallas import tpu as pltpu


# ---------------------------------------------------------------------------
# Fused kernel: KNN scores + dilated top-k + max-relative gather + 1x1 conv + ReLU
# ---------------------------------------------------------------------------
def _dygraph_kernel(*refs, K, D, single_tile, mm_dtype):
    # refs (single_tile):        xf, sq_half, w_self, w_rel, b, out
    # refs (multi row tiles): xr, xf, sq_half, w_self, w_rel, b, out
    if single_tile:
        xf_ref, sqh_ref, ws_ref, wr_ref, b_ref, out_ref = refs
    else:
        xr_ref, xf_ref, sqh_ref, ws_ref, wr_ref, b_ref, out_ref = refs

    xf = xf_ref[0]                                   # (C, N)  all node features (resident/batch)
    xr = xf if single_tile else xr_ref[0]            # (C, TR) query-row features for this tile
    N = xf.shape[1]

    cast = mm_dtype != jnp.float32
    xf_mm = xf.astype(mm_dtype) if cast else xf
    xr_mm = xr.astype(mm_dtype) if cast else xr

    # --- ranking scores: <x_i, x_j> - 0.5*||x_j||^2 (column norms hoisted to the wrapper) ------
    inner = jax.lax.dot_general(
        xr_mm, xf_mm, (((0,), (0,)), ((), ())), preferred_element_type=jnp.float32
    )                                                # (TR, N)
    work = inner - sqh_ref[0]                        # (TR, N); padded columns become -inf

    # (1, N) column iota — broadcast in the compares instead of materialising (TR, N).
    col_f = jax.lax.broadcasted_iota(jnp.int32, (1, N), 1).astype(jnp.float32)
    neg_inf = jnp.float32(-jnp.inf)
    sentinel = jnp.float32(N)

    def _pop_max(_, wk):
        # Dilated-out candidate: no argmax/one-hot needed, just pop the current maxima.
        # (Exact f32 ties get popped together — only differs from top_k on duplicate points.)
        mm = jnp.max(wk, axis=-1, keepdims=True)
        return jnp.where(wk == mm, neg_inf, wk)

    # --- fused dilated top-k selection + max-relative gather (K kept neighbours) ---------------
    maxrel = None
    for ki in range(K):                              # K is small & static -> unrolled
        m = jnp.max(work, axis=-1, keepdims=True)                        # (TR, 1)
        pos = jnp.min(jnp.where(work == m, col_f, sentinel),
                      axis=-1, keepdims=True)                            # first argmax, (TR, 1)
        onehot = col_f == pos                                            # (TR, N) one-hot mask
        sel = onehot.astype(mm_dtype)
        # x_j[c, r] = x_all[c, idx[r, ki]] = sum_n x_all[c, n] * sel[r, n]   (MXU gather)
        xj = jax.lax.dot_general(
            xf_mm, sel, (((1,), (1,)), ((), ())), preferred_element_type=jnp.float32
        )                                                                # (C, TR)
        rel = xj - xr
        maxrel = rel if maxrel is None else jnp.maximum(maxrel, rel)
        if ki + 1 < K:
            work = jnp.where(onehot, neg_inf, work)  # pop the kept candidate (exactly one)
            if D > 1:                                # pop the D-1 dilated-out candidates cheaply
                work = jax.lax.fori_loop(0, D - 1, _pop_max, work, unroll=True)

    # --- 1x1 conv (split weight -> no (2C, N) concat copy) + bias + ReLU -----------------------
    y = (jnp.dot(ws_ref[...], xr, preferred_element_type=jnp.float32)
         + jnp.dot(wr_ref[...], maxrel, preferred_element_type=jnp.float32)
         + b_ref[...])
    out_ref[0] = jnp.maximum(y, 0.0)


# ---------------------------------------------------------------------------
# Generation-aware tiling / VMEM budgeting
# ---------------------------------------------------------------------------
def _vmem_capacity_bytes():
    try:
        info = pltpu.get_tpu_info()
        cap = getattr(info, "vmem_capacity_bytes", None)
        if cap:
            return int(cap)
    except Exception:
        pass
    return 64 * 1024 * 1024  # conservative default (v7x per-core VMEM)


def _estimate_vmem_bytes(C, N, TR, Cout, single_tile):
    f = 4
    resident_x = 2 * C * N * f                  # double-buffered full-x block
    xr_in = 0 if single_tile else 2 * C * TR * f
    sqh = 2 * N * f
    out_b = 2 * Cout * TR * f
    weights = 2 * (2 * Cout * C + Cout) * f
    selection = 6 * TR * N * f                  # work / inner / one-hot + compare temporaries
    return resident_x + xr_in + sqh + out_b + weights + selection


def _choose_row_tile(n_pad, C, Cout, cap_bytes):
    # Lane-dense tiles only: TR is a multiple of 128 dividing n_pad (n_pad is 128-aligned).
    for tr in (256, 128):                       # 256 on 128-MiB-VMEM parts, 128 on v7x / tight fits
        if n_pad % tr == 0 and _estimate_vmem_bytes(C, n_pad, tr, Cout,
                                                    tr == n_pad) <= 0.45 * cap_bytes:
            return tr
    return 128


# ---------------------------------------------------------------------------
# Wrapper: DyGraphConv2d forward
# ---------------------------------------------------------------------------
def dygraph_conv(x, w, b, *, kernel_size, dilation, row_tile=None, matmul_dtype=jnp.float32):
    """x: (B, C, N) f32; w: (Cout, 2C); b: (Cout, 1). Returns (B, Cout, N) f32."""
    B, C, N = x.shape
    Cout = w.shape[0]
    assert w.shape[1] == 2 * C
    k, d = kernel_size, dilation
    assert k >= 1 and d >= 1 and k * d <= N, "kernel_size * dilation must not exceed N"
    assert N < (1 << 24), "f32 column iota used for argmax must be exact"

    # Pad the node axis to a multiple of 128 -> every block is lane-dense (unmasked vst).
    N_pad = max(128, ((N + 127) // 128) * 128)
    x_p = x if N_pad == N else jnp.pad(x, ((0, 0), (0, 0), (0, N_pad - N)))

    # Hoisted 0.5*||x_j||^2 (once per batch, not once per row tile);
    # padded columns get +inf so their score is -inf and they are never selected.
    sq_half = 0.5 * jnp.sum(x_p * x_p, axis=1, keepdims=True)            # (B, 1, N_pad)
    if N_pad != N:
        valid = (jnp.arange(N_pad) < N)[None, None, :]
        sq_half = jnp.where(valid, sq_half, jnp.inf)

    cap = _vmem_capacity_bytes()
    if row_tile is None:
        TR = _choose_row_tile(N_pad, C, Cout, cap)
    else:
        TR = min(row_tile, N_pad)
        assert N_pad % TR == 0 and (TR % 128 == 0 or TR == N_pad)
    single_tile = TR == N_pad

    need = _estimate_vmem_bytes(C, N_pad, TR, Cout, single_tile)
    vmem_limit = int(min(0.9 * cap, max(need + (8 << 20), 32 << 20)))

    w_self = w[:, :C]   # acts on the node's own features
    w_rel = w[:, C:]    # acts on the max-relative aggregated features

    in_specs = [
        pl.BlockSpec((1, C, N_pad), lambda bi, ri: (bi, 0, 0)),   # full x of the batch (resident)
        pl.BlockSpec((1, 1, N_pad), lambda bi, ri: (bi, 0, 0)),   # hoisted 0.5*||x||^2
        pl.BlockSpec((Cout, C), lambda bi, ri: (0, 0)),
        pl.BlockSpec((Cout, C), lambda bi, ri: (0, 0)),
        pl.BlockSpec((Cout, 1), lambda bi, ri: (0, 0)),
    ]
    args = [x_p, sq_half, w_self, w_rel, b]
    if not single_tile:
        # Pipelined query-row tile (prefetched by the Pallas pipeline while the previous
        # tile computes).
        in_specs.insert(0, pl.BlockSpec((1, C, TR), lambda bi, ri: (bi, 0, ri)))
        args.insert(0, x_p)

    out = pl.pallas_call(
        functools.partial(_dygraph_kernel, K=k, D=d,
                          single_tile=single_tile, mm_dtype=matmul_dtype),
        out_shape=jax.ShapeDtypeStruct((B, Cout, N_pad), jnp.float32),
        grid=(B, N_pad // TR),
        in_specs=in_specs,
        out_specs=pl.BlockSpec((1, Cout, TR), lambda bi, ri: (bi, 0, ri)),
        compiler_params=pltpu.CompilerParams(
            dimension_semantics=("parallel", "parallel"),   # both axes shard across TCs (v7x)
            vmem_limit_bytes=vmem_limit,
        ),
    )(*args)
    return out if N_pad == N else out[:, :, :N]


# ---------------------------------------------------------------------------
# Pure-JAX reference (same semantics as the torch module)
# ---------------------------------------------------------------------------
def dygraph_conv_ref(x, w, b, *, kernel_size, dilation):
    B, C, N = x.shape
    hp = jax.lax.Precision.HIGHEST
    xt = jnp.transpose(x, (0, 2, 1))                               # (B, N, C)
    sq = jnp.sum(xt * xt, axis=-1, keepdims=True)                  # (B, N, 1)
    dist = (sq - 2.0 * jnp.einsum("bnc,bmc->bnm", xt, xt, precision=hp)
            + jnp.transpose(sq, (0, 2, 1)))
    _, nn_idx = jax.lax.top_k(-dist, kernel_size * dilation)
    nn_idx = nn_idx[:, :, ::dilation]                              # (B, N, k)
    x_j = jax.vmap(lambda xb, ib: xb[:, ib])(x, nn_idx)            # (B, C, N, k)
    rel_max = jnp.max(x_j - x[..., None], axis=-1)                 # (B, C, N)
    feat = jnp.concatenate([x, rel_max], axis=1)                   # (B, 2C, N)
    y = jnp.einsum("oc,bcn->bon", w, feat, precision=hp) + b[None] # (B, Cout, N)
    return jnp.maximum(y, 0.0)


if __name__ == "__main__":
    root = jax.random.PRNGKey(0)

    def run_case(key, B, C, N, Cout, k, d, row_tile=None):
        kx, kw, kb = jax.random.split(key, 3)
        x = jax.random.normal(kx, (B, C, N), dtype=jnp.float32)
        # Deterministic parameter init (Conv1d 1x1: weight (Cout, 2C), bias (Cout, 1))
        w = jax.random.normal(kw, (Cout, 2 * C), dtype=jnp.float32) * 0.1
        b = jax.random.normal(kb, (Cout, 1), dtype=jnp.float32) * 0.1

        out = dygraph_conv(x, w, b, kernel_size=k, dilation=d, row_tile=row_tile)
        out = jax.block_until_ready(out)
        ref = dygraph_conv_ref(x, w, b, kernel_size=k, dilation=d)
        assert out.shape == (B, Cout, N), out.shape
        assert jnp.allclose(out, ref, rtol=1e-4, atol=1e-4), "mismatch vs reference"

    # Small shapes consistent with the module's forward (x: (B, C, N)).
    run_case(root, B=2, C=4, N=16, Cout=8, k=4, d=2)                 # padded-N, single-tile path
    run_case(jax.random.fold_in(root, 1),
             B=2, C=4, N=256, Cout=8, k=3, d=1, row_tile=128)        # multi-row-tile pipelined path

    print("KERNEL_OK")
</pallas_src>

<mosaic_0001>
module attributes {stable_mosaic.version = 11 : i64} {
  func.func @_dygraph_kernel(%arg0: i32, %arg1: i32, %arg2: memref<1x4x128xf32, #tpu.memory_space<vmem>>, %arg3: memref<1x1x128xf32, #tpu.memory_space<vmem>>, %arg4: memref<8x4xf32, #tpu.memory_space<vmem>>, %arg5: memref<8x4xf32, #tpu.memory_space<vmem>>, %arg6: memref<8x1xf32, #tpu.memory_space<vmem>>, %arg7: memref<1x8x128xf32, #tpu.memory_space<vmem>>) attributes {dimension_semantics = [#tpu.dimension_semantics<parallel>, #tpu.dimension_semantics<parallel>], iteration_bounds = array<i64: 2, 1>, scalar_prefetch = 0 : i64, scratch_operands = 0 : i64, tpu.core_type = #tpu.core_type<tc>, window_params = [{transform_indices = @transform_0, window_bounds = array<i64: 1, 4, 128>}, {transform_indices = @transform_1, window_bounds = array<i64: 1, 1, 128>}, {pipeline_mode = #tpu.pipeline_mode<synchronous>, transform_indices = @transform_2, window_bounds = array<i64: 8, 4>}, {pipeline_mode = #tpu.pipeline_mode<synchronous>, transform_indices = @transform_3, window_bounds = array<i64: 8, 4>}, {pipeline_mode = #tpu.pipeline_mode<synchronous>, transform_indices = @transform_4, window_bounds = array<i64: 8, 1>}, {transform_indices = @transform_5, window_bounds = array<i64: 1, 8, 128>}]} {
    %c0 = arith.constant 0 : index
    %c0_0 = arith.constant 0 : index
    %c0_1 = arith.constant 0 : index
    %0 = vector.load %arg2[%c0, %c0_0, %c0_1] : memref<1x4x128xf32, #tpu.memory_space<vmem>>, vector<1x4x128xf32>
    %1 = vector.shape_cast %0 : vector<1x4x128xf32> to vector<4x128xf32>
    %cst = arith.constant dense<0.000000e+00> : vector<128x128xf32>
    %2 = tpu.matmul %1, %1, %cst {dimension_numbers = #tpu.dot_dimension_numbers<[0], [0], [1], [1], [0, 1, 1, 1], [], []>} : vector<4x128xf32>, vector<4x128xf32>, vector<128x128xf32> -> vector<128x128xf32>
    %c0_2 = arith.constant 0 : index
    %c0_3 = arith.constant 0 : index
    %c0_4 = arith.constant 0 : index
    %3 = vector.load %arg3[%c0_2, %c0_3, %c0_4] : memref<1x1x128xf32, #tpu.memory_space<vmem>>, vector<1x1x128xf32>
    %4 = vector.shape_cast %3 : vector<1x1x128xf32> to vector<1x128xf32>
    %5 = vector.broadcast %4 : vector<1x128xf32> to vector<128x128xf32>
    %6 = arith.subf %2, %5 : vector<128x128xf32>
    %7 = tpu.iota {dimensions = array<i32: 1>} : vector<1x128xi32>
    %8 = arith.sitofp %7 : vector<1x128xi32> to vector<1x128xf32>
    %cst_5 = arith.constant dense<0xFF800000> : vector<128xf32>
    %9 = vector.multi_reduction <maximumf>, %6, %cst_5 [1] : vector<128x128xf32> to vector<128xf32>
    %10 = vector.shape_cast %9 : vector<128xf32> to vector<128x1xf32>
    %11 = vector.broadcast %10 : vector<128x1xf32> to vector<128x128xf32>
    %12 = arith.cmpf oeq, %6, %11 : vector<128x128xf32>
    %cst_6 = arith.constant 1.280000e+02 : f32
    %13 = vector.shape_cast %8 : vector<1x128xf32> to vector<1x128xf32>
    %14 = vector.broadcast %13 : vector<1x128xf32> to vector<128x128xf32>
    %15 = vector.broadcast %cst_6 : f32 to vector<128x128xf32>
    %16 = arith.select %12, %14, %15 : vector<128x128xi1>, vector<128x128xf32>
    %cst_7 = arith.constant dense<0x7F800000> : vector<128xf32>
    %17 = vector.multi_reduction <minimumf>, %16, %cst_7 [1] : vector<128x128xf32> to vector<128xf32>
    %18 = vector.shape_cast %17 : vector<128xf32> to vector<128x1xf32>
    %19 = vector.broadcast %8 : vector<1x128xf32> to vector<128x128xf32>
    %20 = vector.broadcast %18 : vector<128x1xf32> to vector<128x128xf32>
    %21 = arith.cmpf oeq, %19, %20 : vector<128x128xf32>
    %22 = arith.extui %21 : vector<128x128xi1> to vector<128x128xi32>
    %23 = arith.sitofp %22 : vector<128x128xi32> to vector<128x128xf32>
    %cst_8 = arith.constant dense<0.000000e+00> : vector<4x128xf32>
    %24 = tpu.matmul %1, %23, %cst_8 {dimension_numbers = #tpu.dot_dimension_numbers<[1], [1], [0], [0], [0, 0, 1, 0], [], []>} : vector<4x128xf32>, vector<128x128xf32>, vector<4x128xf32> -> vector<4x128xf32>
    %25 = arith.subf %24, %1 : vector<4x128xf32>
    %cst_9 = arith.constant 0xFF800000 : f32
    %26 = vector.broadcast %cst_9 : f32 to vector<128x128xf32>
    %27 = arith.select %21, %26, %6 : vector<128x128xi1>, vector<128x128xf32>
    %cst_10 = arith.constant 0xFF800000 : f32
    %c0_i32 = arith.constant 0 : i32
    %cst_11 = arith.constant dense<0xFF800000> : vector<128xf32>
    %28 = vector.multi_reduction <maximumf>, %27, %cst_11 [1] : vector<128x128xf32> to vector<128xf32>
    %29 = vector.shape_cast %28 : vector<128xf32> to vector<128x1xf32>
    %30 = vector.broadcast %29 : vector<128x1xf32> to vector<128x128xf32>
    %31 = arith.cmpf oeq, %27, %30 : vector<128x128xf32>
    %32 = vector.broadcast %cst_10 : f32 to vector<128x128xf32>
    %33 = arith.select %31, %32, %27 : vector<128x128xi1>, vector<128x128xf32>
    %cst_12 = arith.constant dense<0xFF800000> : vector<128xf32>
    %34 = vector.multi_reduction <maximumf>, %33, %cst_12 [1] : vector<128x128xf32> to vector<128xf32>
    %35 = vector.shape_cast %34 : vector<128xf32> to vector<128x1xf32>
    %36 = vector.broadcast %35 : vector<128x1xf32> to vector<128x128xf32>
    %37 = arith.cmpf oeq, %33, %36 : vector<128x128xf32>
    %cst_13 = arith.constant 1.280000e+02 : f32
    %38 = vector.shape_cast %8 : vector<1x128xf32> to vector<1x128xf32>
    %39 = vector.broadcast %38 : vector<1x128xf32> to vector<128x128xf32>
    %40 = vector.broadcast %cst_13 : f32 to vector<128x128xf32>
    %41 = arith.select %37, %39, %40 : vector<128x128xi1>, vector<128x128xf32>
    %cst_14 = arith.constant dense<0x7F800000> : vector<128xf32>
    %42 = vector.multi_reduction <minimumf>, %41, %cst_14 [1] : vector<128x128xf32> to vector<128xf32>
    %43 = vector.shape_cast %42 : vector<128xf32> to vector<128x1xf32>
    %44 = vector.broadcast %8 : vector<1x128xf32> to vector<128x128xf32>
    %45 = vector.broadcast %43 : vector<128x1xf32> to vector<128x128xf32>
    %46 = arith.cmpf oeq, %44, %45 : vector<128x128xf32>
    %47 = arith.extui %46 : vector<128x128xi1> to vector<128x128xi32>
    %48 = arith.sitofp %47 : vector<128x128xi32> to vector<128x128xf32>
    %cst_15 = arith.constant dense<0.000000e+00> : vector<4x128xf32>
    %49 = tpu.matmul %1, %48, %cst_15 {dimension_numbers = #tpu.dot_dimension_numbers<[1], [1], [0], [0], [0, 0, 1, 0], [], []>} : vector<4x128xf32>, vector<128x128xf32>, vector<4x128xf32> -> vector<4x128xf32>
    %50 = arith.subf %49, %1 : vector<4x128xf32>
    %51 = arith.maximumf %25, %50 : vector<4x128xf32>
    %cst_16 = arith.constant 0xFF800000 : f32
    %52 = vector.broadcast %cst_16 : f32 to vector<128x128xf32>
    %53 = arith.select %46, %52, %33 : vector<128x128xi1>, vector<128x128xf32>
    %cst_17 = arith.constant 0xFF800000 : f32
    %c0_i32_18 = arith.constant 0 : i32
    %cst_19 = arith.constant dense<0xFF800000> : vector<128xf32>
    %54 = vector.multi_reduction <maximumf>, %53, %cst_19 [1] : vector<128x128xf32> to vector<128xf32>
    %55 = vector.shape_cast %54 : vector<128xf32> to vector<128x1xf32>
    %56 = vector.broadcast %55 : vector<128x1xf32> to vector<128x128xf32>
    %57 = arith.cmpf oeq, %53, %56 : vector<128x128xf32>
    %58 = vector.broadcast %cst_17 : f32 to vector<128x128xf32>
    %59 = arith.select %57, %58, %53 : vector<128x128xi1>, vector<128x128xf32>
    %cst_20 = arith.constant dense<0xFF800000> : vector<128xf32>
    %60 = vector.multi_reduction <maximumf>, %59, %cst_20 [1] : vector<128x128xf32> to vector<128xf32>
    %61 = vector.shape_cast %60 : vector<128xf32> to vector<128x1xf32>
    %62 = vector.broadcast %61 : vector<128x1xf32> to vector<128x128xf32>
    %63 = arith.cmpf oeq, %59, %62 : vector<128x128xf32>
    %cst_21 = arith.constant 1.280000e+02 : f32
    %64 = vector.shape_cast %8 : vector<1x128xf32> to vector<1x128xf32>
    %65 = vector.broadcast %64 : vector<1x128xf32> to vector<128x128xf32>
    %66 = vector.broadcast %cst_21 : f32 to vector<128x128xf32>
    %67 = arith.select %63, %65, %66 : vector<128x128xi1>, vector<128x128xf32>
    %cst_22 = arith.constant dense<0x7F800000> : vector<128xf32>
    %68 = vector.multi_reduction <minimumf>, %67, %cst_22 [1] : vector<128x128xf32> to vector<128xf32>
    %69 = vector.shape_cast %68 : vector<128xf32> to vector<128x1xf32>
    %70 = vector.broadcast %8 : vector<1x128xf32> to vector<128x128xf32>
    %71 = vector.broadcast %69 : vector<128x1xf32> to vector<128x128xf32>
    %72 = arith.cmpf oeq, %70, %71 : vector<128x128xf32>
    %73 = arith.extui %72 : vector<128x128xi1> to vector<128x128xi32>
    %74 = arith.sitofp %73 : vector<128x128xi32> to vector<128x128xf32>
    %cst_23 = arith.constant dense<0.000000e+00> : vector<4x128xf32>
    %75 = tpu.matmul %1, %74, %cst_23 {dimension_numbers = #tpu.dot_dimension_numbers<[1], [1], [0], [0], [0, 0, 1, 0], [], []>} : vector<4x128xf32>, vector<128x128xf32>, vector<4x128xf32> -> vector<4x128xf32>
    %76 = arith.subf %75, %1 : vector<4x128xf32>
    %77 = arith.maximumf %51, %76 : vector<4x128xf32>
    %cst_24 = arith.constant 0xFF800000 : f32
    %78 = vector.broadcast %cst_24 : f32 to vector<128x128xf32>
    %79 = arith.select %72, %78, %59 : vector<128x128xi1>, vector<128x128xf32>
    %cst_25 = arith.constant 0xFF800000 : f32
    %c0_i32_26 = arith.constant 0 : i32
    %cst_27 = arith.constant dense<0xFF800000> : vector<128xf32>
    %80 = vector.multi_reduction <maximumf>, %79, %cst_27 [1] : vector<128x128xf32> to vector<128xf32>
    %81 = vector.shape_cast %80 : vector<128xf32> to vector<128x1xf32>
    %82 = vector.broadcast %81 : vector<128x1xf32> to vector<128x128xf32>
    %83 = arith.cmpf oeq, %79, %82 : vector<128x128xf32>
    %84 = vector.broadcast %cst_25 : f32 to vector<128x128xf32>
    %85 = arith.select %83, %84, %79 : vector<128x128xi1>, vector<128x128xf32>
    %cst_28 = arith.constant dense<0xFF800000> : vector<128xf32>
    %86 = vector.multi_reduction <maximumf>, %85, %cst_28 [1] : vector<128x128xf32> to vector<128xf32>
    %87 = vector.shape_cast %86 : vector<128xf32> to vector<128x1xf32>
    %88 = vector.broadcast %87 : vector<128x1xf32> to vector<128x128xf32>
    %89 = arith.cmpf oeq, %85, %88 : vector<128x128xf32>
    %cst_29 = arith.constant 1.280000e+02 : f32
    %90 = vector.shape_cast %8 : vector<1x128xf32> to vector<1x128xf32>
    %91 = vector.broadcast %90 : vector<1x128xf32> to vector<128x128xf32>
    %92 = vector.broadcast %cst_29 : f32 to vector<128x128xf32>
    %93 = arith.select %89, %91, %92 : vector<128x128xi1>, vector<128x128xf32>
    %cst_30 = arith.constant dense<0x7F800000> : vector<128xf32>
    %94 = vector.multi_reduction <minimumf>, %93, %cst_30 [1] : vector<128x128xf32> to vector<128xf32>
    %95 = vector.shape_cast %94 : vector<128xf32> to vector<128x1xf32>
    %96 = vector.broadcast %8 : vector<1x128xf32> to vector<128x128xf32>
    %97 = vector.broadcast %95 : vector<128x1xf32> to vector<128x128xf32>
    %98 = arith.cmpf oeq, %96, %97 : vector<128x128xf32>
    %99 = arith.extui %98 : vector<128x128xi1> to vector<128x128xi32>
    %100 = arith.sitofp %99 : vector<128x128xi32> to vector<128x128xf32>
    %cst_31 = arith.constant dense<0.000000e+00> : vector<4x128xf32>
    %101 = tpu.matmul %1, %100, %cst_31 {dimension_numbers = #tpu.dot_dimension_numbers<[1], [1], [0], [0], [0, 0, 1, 0], [], []>} : vector<4x128xf32>, vector<128x128xf32>, vector<4x128xf32> -> vector<4x128xf32>
    %102 = arith.subf %101, %1 : vector<4x128xf32>
    %103 = arith.maximumf %77, %102 : vector<4x128xf32>
    %c0_32 = arith.constant 0 : index
    %c0_33 = arith.constant 0 : index
    %104 = vector.load %arg4[%c0_32, %c0_33] : memref<8x4xf32, #tpu.memory_space<vmem>>, vector<8x4xf32>
    %cst_34 = arith.constant dense<0.000000e+00> : vector<8x128xf32>
    %105 = tpu.matmul %104, %1, %cst_34 {dimension_numbers = #tpu.dot_dimension_numbers<[1], [0], [0], [1], [0, 0, 1, 1], [], []>} : vector<8x4xf32>, vector<4x128xf32>, vector<8x128xf32> -> vector<8x128xf32>
    %c0_35 = arith.constant 0 : index
    %c0_36 = arith.constant 0 : index
    %106 = vector.load %arg5[%c0_35, %c0_36] : memref<8x4xf32, #tpu.memory_space<vmem>>, vector<8x4xf32>
    %cst_37 = arith.constant dense<0.000000e+00> : vector<8x128xf32>
    %107 = tpu.matmul %106, %103, %cst_37 {dimension_numbers = #tpu.dot_dimension_numbers<[1], [0], [0], [1], [0, 0, 1, 1], [], []>} : vector<8x4xf32>, vector<4x128xf32>, vector<8x128xf32> -> vector<8x128xf32>
    %108 = arith.addf %105, %107 : vector<8x128xf32>
    %c0_38 = arith.constant 0 : index
    %c0_39 = arith.constant 0 : index
    %109 = vector.load %arg6[%c0_38, %c0_39] : memref<8x1xf32, #tpu.memory_space<vmem>>, vector<8x1xf32>
    %110 = vector.broadcast %109 : vector<8x1xf32> to vector<8x128xf32>
    %111 = arith.addf %108, %110 : vector<8x128xf32>
    %cst_40 = arith.constant 0.000000e+00 : f32
    %112 = vector.broadcast %cst_40 : f32 to vector<8x128xf32>
    %113 = arith.maximumf %111, %112 : vector<8x128xf32>
    %c0_41 = arith.constant 0 : index
    %c0_42 = arith.constant 0 : index
    %c0_43 = arith.constant 0 : index
    %114 = vector.load %arg7[%c0_41, %c0_42, %c0_43] : memref<1x8x128xf32, #tpu.memory_space<vmem>>, vector<1x8x128xf32>
    %115 = vector.shape_cast %114 : vector<1x8x128xf32> to vector<8x128xf32>
    %116 = vector.shape_cast %113 : vector<8x128xf32> to vector<1x8x128xf32>
    tpu.vector_store %arg7[%c0_41, %c0_42, %c0_43], %116 {strides = array<i32>} : memref<1x8x128xf32, #tpu.memory_space<vmem>>, vector<1x8x128xf32>,
    return
  }
  func.func @transform_0(%arg0: i32, %arg1: i32) -> (i32, i32, i32) {
    %c0_i32 = arith.constant 0 : i32
    %c0_i32_0 = arith.constant 0 : i32
    %c0_i32_1 = arith.constant 0 : i32
    return %arg0, %c0_i32, %c0_i32_0 : i32, i32, i32
  }
  func.func @transform_1(%arg0: i32, %arg1: i32) -> (i32, i32, i32) {
    %c0_i32 = arith.constant 0 : i32
    %c0_i32_0 = arith.constant 0 : i32
    %c0_i32_1 = arith.constant 0 : i32
    return %arg0, %c0_i32, %c0_i32_0 : i32, i32, i32
  }
  func.func @transform_2(%arg0: i32, %arg1: i32) -> (i32, i32) {
    %c0_i32 = arith.constant 0 : i32
    %c0_i32_0 = arith.constant 0 : i32
    %c0_i32_1 = arith.constant 0 : i32
    return %c0_i32, %c0_i32_0 : i32, i32
  }
  func.func @transform_3(%arg0: i32, %arg1: i32) -> (i32, i32) {
    %c0_i32 = arith.constant 0 : i32
    %c0_i32_0 = arith.constant 0 : i32
    %c0_i32_1 = arith.constant 0 : i32
    return %c0_i32, %c0_i32_0 : i32, i32
  }
  func.func @transform_4(%arg0: i32, %arg1: i32) -> (i32, i32) {
    %c0_i32 = arith.constant 0 : i32
    %c0_i32_0 = arith.constant 0 : i32
    %c0_i32_1 = arith.constant 0 : i32
    return %c0_i32, %c0_i32_0 : i32, i32
  }
  func.func @transform_5(%arg0: i32, %arg1: i32) -> (i32, i32, i32) {
    %c0_i32 = arith.constant 0 : i32
    %c0_i32_0 = arith.constant 0 : i32
    return %arg0, %c0_i32, %arg1 : i32, i32, i32
  }
}

</mosaic_0001>

<bundles_post_ra>
// kernel: tpu_custom_call.1
= control target key start
LH: loop header
LB: loop body
LE: loop exit
PB: predicated region body
PF: predicated region fallthrough
CT: control target
= control target key end

     0   :  { %10 = vsyncpa [#allocation3], 0  ;;  %s3481_s0 = inlined_call_operand.vmem [shape: f32[2,4,128], index: 0, kind: input, shape index: {}]   ;;  %s3482_s1 = inlined_call_operand.vmem [shape: f32[2,1,128], index: 1, kind: input, shape index: {}]   ;;  %s3483_s2 = inlined_call_operand.vmem [shape: f32[8,4], index: 2, kind: input, shape index: {}]   ;;  %s3484_s3 = inlined_call_operand.vmem [shape: f32[8,4], index: 3, kind: input, shape index: {}]   ;;  %s3485_s4 = inlined_call_operand.vmem [shape: f32[8,1], index: 4, kind: input, shape index: {}]   ;;  %s3486_s5 = inlined_call_operand.hbm [shape: f32[2,8,128], index: 5, kind: output, shape index: {}]  }
   0x1   :  { %12 = vsyncpa [#allocation3 + $0x1], 0  ;;  %s2561_s18 = smov 0   ;;  %s2563_s19 = smov 0  }
   0x2   :  { %s2565_s20 = smov 0   ;;  %s2567_s21 = smov 0  }
   0x3   :  { %s2569_s22 = smov 0   ;;  %s2571_s23 = smov 0  }
   0x4 LB: > { %s1860_s24 = sadd.s32 4294967295, %s2523_s23   ;;  %s1861_s25 = sadd.s32 4294967294, %s2523_s23   ;;  %s2523_s23 = sphi %s2571_s23, %s18_s23   ;;  %s2519_s22 = sphi %s2569_s22, %s3493_s22   ;;  %s2515_s21 = sphi %s2567_s21, %s3492_s21   ;;  %s2511_s20 = sphi %s2565_s20, %s3491_s20   ;;  %s2507_s19 = sphi %s2563_s19, %s3490_s19   ;;  %s2503_s18 = sphi %s2561_s18, %s3489_s18  }
   0x5   : > { %s30_s26 = sadd.s32 1, %s2519_s22  ;;  %s154_s27 = sadd.s32 1, %s2511_s20 }
   0x6   : > { %p32_p0 = scmp.ge.s32.totalorder %s30_s26, 2  ;;  %p164_p1 = scmp.ne.s32.totalorder %s2511_s20, %s2507_s19 }
   0x7   : > { %p165_p2 = scmp.eq.s32.totalorder %s1860_s24, 1  ;;  %p170_p3 = scmp.ne.s32.totalorder %s2507_s19, %s2503_s18 }
   0x8   : > { %s3495_s26 = smov (%p32_p0, %s30_s26), 0  ;;  %p171_p5 = scmp.eq.s32.totalorder %s1861_s25, 1 }
   0x9   : > { %p2601_p4 = por %p165_p2, %p164_p1  ;;  %s149_s29 = ssub.s32 %s2519_s22, %s3495_s26 }
   0xa   : > { %p1864_p6 = scmp.ge.s32.totalorder %s2523_s23, 1  ;;  %p152_p7 = scmp.eq.s32.totalorder %s149_s29, 0 }
   0xb   : > { %p2608_p8 = por %p171_p5, %p170_p3  ;;  %p211_p9 = scmp.lt.s32.totalorder %s2523_s23, 3 }
   0xc   : > { %s2614_s6 = scalar_select %p152_p7, %s2511_s20, %s154_s27  }
   0xd   : > { %p212_p10 = pnand %p1864_p6, %p211_p9 }
   0xe   : > { %p241_p11 = scmp.lt.s32.totalorder (!%p212_p10), %s2515_s21, 1  ;;  %vm330_vm0 = vcmask (!%p212_p10), 1043456   ;;  %vm281_vm1 = vcmask (!%p212_p10), 31744   ;;  %v502_v50 = vlaneseq (!%p212_p10)  ;;  %s238_s29 = sand.u32 (!%p212_p10), 1, %s2507_s19  }
   0xf   : > { %215 = sbr.rel (%p212_p10) target bundleno = 2478 (0x9ae), region = 40 }
  0x10   : > { %v503_v51 = vand.u32 (!%p212_p10), 127, %v502_v50 }
  0x12   : > { %v2697_v52 = vcvt.s32.f32 (!%p212_p10), %v503_v51 }
  0x16   : > { %s2618_s7 = scalar_select %p241_p11, %s2515_s21, 1 }
  0x18   : > { %s1866_s8 = sshll.u32 %s2618_s7, 2  ;;  %s247_s14 = scalar_lea.vmem %s3482_s1, %s2618_s7 }
  0x19   : > { %s2624_s11 = scalar_lea.vmem %s3481_s0, %s1866_s8  ;;  %v1884_v17 = vld [vmem:[%s247_s14] ss:$0 sm:$0xff]  ;;  %s1865_s7 = sshll.u32 %s238_s29, 3 }
  0x1a   : > { %v248_v0 = vld [vmem:[%s2624_s11] sm:$0xf]  ;;  %s2018_s8 = sshll.u32 %s2515_s21, 7  ;;  %s240_s9 = scalar_lea.vmem [#allocation2], %s1865_s7 }
  0x1b   : > { %249 = vxpose.xlu0.b32.start.end [1/1] (short) %v248_v0, 128  ;;  %2110 = vmatprep.subr.msk.mxu0 %vm330_vm0, %v248_v0  ;;  %s1783_s10 = sshll.u32 %s240_s9, 4  ;;  %s3434_s13 = scalar_lea.hbm %s3486_s5, %s2018_s8  ;;  %s3436_s10 = int_to_ptr.vmem [resolvable:$true] %s1783_s10 }
  0x1c   : > { %2111 = vmatpush3.msk.msra.mxu0 %vm330_vm0, %v248_v0  ;;  %s1769_s14 = scalar_lea.sflag [#allocation3], %s238_s29  ;;  %s2445_s15 = scalar_lea.vmem %s3436_s10, 128 }
  0x1d   : > { %p2446_p12 = scmp.ne.s32.totalorder %s3436_s10, %s2445_s15  ;;  %s2530_s21 = smov [#allocation2]  }
  0x1e   : > { %s2449_s16 = sshll.u32 %s2530_s21, 4  ;;  %s2450_s16 = int_to_ptr.vmem [resolvable:$false] %s2449_s16 }
  0x1f   : > { %p2447_p13 = pnand %p2446_p12, %p2601_p4  ;;  %s2451_s17 = scalar_lea.vmem %s2450_s16, 256 }
  0x20   : > { %p2452_p1 = scmp.lt.s32.totalorder %s3436_s10, %s2450_s16  ;;  %p2453_p2 = scmp.lt.s32.totalorder %s2451_s17, %s2445_s15 }
  0x21   : > { %p2448_p0 = pneg %p2447_p13 }
  0x22   : > { %p2454_p3 = por %p2453_p2, %p2452_p1 }
  0x24   : > { %p2455_p5 = pnand %p2454_p3, %p2448_p0 }
  0x9b   : > { %v265_v1 = vpop.trf.xlu0 }
  0x9c   : > { %2112 = vmatprep.mubr.msk.f32.mxu0 %vm281_vm1, %v265_v1  ;;  %v2525_v1 = vmov 0.0|0.0  }
  0x9d   : > { %2286 = vmatprep.subr.bf16.mxu1 %v2525_v1  ;;  %2310 = vmatprep.subr.bf16.mxu0 %v2525_v1 }
  0x9f   : > { %v266_v2 = vpop.trf.xlu0 }
  0xa0   : > { %2113 = vmatmul.mubr.msk.f32.vlgmr.msra.gmra.mrb[0].mxu0 %vm281_vm1, %v266_v2 }
  0xa3   : > { %v267_v3 = vpop.trf.xlu0 }
  0xa4   : > { %2115 = vmatprep.mubr.msk.f32.mxu0 %vm281_vm1, %v267_v3 }
  0xa7   : > { %v268_v4 = vpop.trf.xlu0 }
  0xa8   : > { %2116 = vmatmul.mubr.msk.f32.gmra.mrb[2].mxu0 %vm281_vm1, %v268_v4 }
  0xab   : > { %v269_v5 = vpop.trf.xlu0 }
  0xac   : > { %2118 = vmatprep.mubr.msk.f32.mxu0 %vm281_vm1, %v269_v5 }
  0xaf   : > { %v270_v6 = vpop.trf.xlu0 }
  0xb0   : > { %2119 = vmatmul.mubr.msk.f32.gmra.mrb[4].mxu0 %vm281_vm1, %v270_v6 }
  0xb3   : > { %v271_v7 = vpop.trf.xlu0 }
  0xb4   : > { %2121 = vmatprep.mubr.msk.f32.mxu0 %vm281_vm1, %v271_v7 }
  0xb7   : > { %v272_v8 = vpop.trf.xlu0 }
  0xb8   : > { %2122 = vmatmul.mubr.msk.f32.gmra.mrb[6].mxu0 %vm281_vm1, %v272_v8 }
  0xbb   : > { %v273_v9 = vpop.trf.xlu0 }
  0xbc   : > { %2124 = vmatprep.mubr.msk.f32.mxu0 %vm281_vm1, %v273_v9 }
  0xbf   : > { %v274_v10 = vpop.trf.xlu0 }
  0xc0   : > { %2125 = vmatmul.mubr.msk.f32.gmra.mrb[8].mxu0 %vm281_vm1, %v274_v10 }
  0xc3   : > { %v275_v11 = vpop.trf.xlu0 }
  0xc4   : > { %2127 = vmatprep.mubr.msk.f32.mxu0 %vm281_vm1, %v275_v11 }
  0xc7   : > { %v276_v12 = vpop.trf.xlu0 }
  0xc8   : > { %2128 = vmatmul.mubr.msk.f32.gmra.mrb[10].mxu0 %vm281_vm1, %v276_v12 }
  0xcb   : > { %v277_v13 = vpop.trf.xlu0 }
  0xcc   : > { %2130 = vmatprep.mubr.msk.f32.mxu0 %vm281_vm1, %v277_v13 }
  0xcf   : > { %v278_v14 = vpop.trf.xlu0 }
  0xd0   : > { %2131 = vmatmul.mubr.msk.f32.gmra.mrb[12].mxu0 %vm281_vm1, %v278_v14 }
  0xd3   : > { %v279_v15 = vpop.trf.xlu0 }
  0xd4   : > { %2133 = vmatprep.mubr.msk.f32.mxu0 %vm281_vm1, %v279_v15 }
  0xd7   : > { %v280_v16 = vpop.trf.xlu0 }
  0xd8   : > { %2134 = vmatmul.mubr.msk.f32.gmra.mrb[14].mxu0 %vm281_vm1, %v280_v16 }
 0x173   : > { %v2114_v18 = vpop.f32.mrb[0].mxu0 }
 0x174   : > { %v2649_v19 = vsub.f32 %v2114_v18, %v1884_v17  ;;  %v400_v20 = vpop.f32.mrb[1].mxu0 }
 0x175   : > { %v2651_v21 = vsub.f32 %v400_v20, %v1884_v17 }
 0x176   : > { %507 = vmax.xlane.f32.xlu1 %v2649_v19 }
 0x177   : > { %505 = vmax.xlane.f32.xlu0 %v2651_v21 }
 0x17b   : > { %v2117_v22 = vpop.f32.mrb[2].mxu0 }
 0x17c   : > { %v2655_v23 = vsub.f32 %v2117_v22, %v1884_v17  ;;  %v410_v24 = vpop.f32.mrb[3].mxu0 }
 0x17d   : > { %v2657_v25 = vsub.f32 %v410_v24, %v1884_v17 }
 0x17e   : > { %511 = vmax.xlane.f32.xlu1 %v2655_v23 }
 0x182   : > { %509 = vmax.xlane.f32.xlu1 %v2657_v25 }
 0x183   : > { %v2120_v26 = vpop.f32.mrb[4].mxu0 }
 0x184   : > { %v2661_v27 = vsub.f32 %v2120_v26, %v1884_v17  ;;  %v420_v28 = vpop.f32.mrb[5].mxu0 }
 0x185   : > { %v2663_v29 = vsub.f32 %v420_v28, %v1884_v17 }
 0x186   : > { %515 = vmax.xlane.f32.xlu1 %v2661_v27 }
 0x18a   : > { %513 = vmax.xlane.f32.xlu1 %v2663_v29 }
 0x18b   : > { %v2123_v30 = vpop.f32.mrb[6].mxu0 }
 0x18c   : > { %v2667_v31 = vsub.f32 %v2123_v30, %v1884_v17  ;;  %v430_v32 = vpop.f32.mrb[7].mxu0 }
 0x18d   : > { %v2669_v33 = vsub.f32 %v430_v32, %v1884_v17 }
 0x18e   : > { %519 = vmax.xlane.f32.xlu1 %v2667_v31 }
 0x192   : > { %517 = vmax.xlane.f32.xlu1 %v2669_v33 }
 0x193   : > { %v2126_v34 = vpop.f32.mrb[8].mxu0 }
 0x194   : > { %v2673_v35 = vsub.f32 %v2126_v34, %v1884_v17  ;;  %v440_v36 = vpop.f32.mrb[9].mxu0  ;;  %v2526_v34 = vmov 1.0|1.0  }
 0x195   : > { %v2675_v37 = vsub.f32 %v440_v36, %v1884_v17 }
 0x196   : > { %523 = vmax.xlane.f32.xlu1 %v2673_v35 }
 0x19a   : > { %521 = vmax.xlane.f32.xlu1 %v2675_v37 }
 0x19b   : > { %v2129_v38 = vpop.f32.mrb[10].mxu0 }
 0x19c   : > { %v2679_v39 = vsub.f32 %v2129_v38, %v1884_v17  ;;  %v450_v40 = vpop.f32.mrb[11].mxu0 }
 0x19d   : > { %v2681_v41 = vsub.f32 %v450_v40, %v1884_v17 }
 0x19e   : > { %527 = vmax.xlane.f32.xlu1 %v2679_v39 }
 0x1a2   : > { %525 = vmax.xlane.f32.xlu1 %v2681_v41 }
 0x1a3   : > { %v2132_v42 = vpop.f32.mrb[12].mxu0 }
 0x1a4   : > { %v2685_v43 = vsub.f32 %v2132_v42, %v1884_v17  ;;  %v460_v44 = vpop.f32.mrb[13].mxu0 }
 0x1a5   : > { %v2687_v45 = vsub.f32 %v460_v44, %v1884_v17 }
 0x1a6   : > { %531 = vmax.xlane.f32.xlu1 %v2685_v43 }
 0x1aa   : > { %529 = vmax.xlane.f32.xlu1 %v2687_v45 }
 0x1ab   : > { %v2135_v46 = vpop.f32.mrb[14].mxu0 }
 0x1ac   : > { %v2691_v47 = vsub.f32 %v2135_v46, %v1884_v17  ;;  %v470_v48 = vpop.f32.mrb[15].mxu0 }
 0x1ad   : > { %v2693_v49 = vsub.f32 %v470_v48, %v1884_v17 }
 0x1af   : > { %533 = vmax.xlane.f32.xlu1 %v2693_v49 }
 0x1b3   : > { %535 = vmax.xlane.f32.xlu1 %v2691_v47 }
 0x203   : > { %v508_v53 = vpop.xlane.xlu1 %507 }
 0x204   : > { %v506_v54 = vpop.xlane.xlu0 %505  ;;  %vm538_vm2 = vcmp.eq.f32.partialorder %v2649_v19, %v508_v53 }
 0x205   : > { %v554_v55 = vsel %vm538_vm2, %v2697_v52, 128.0  ;;  %vm537_vm3 = vcmp.eq.f32.partialorder %v2651_v21, %v506_v54 }
 0x206   : > { %571 = vmin.xlane.f32.xlu1 %v554_v55  ;;  %v553_v56 = vsel %vm537_vm3, %v2697_v52, 128.0 }
 0x20a   : > { %569 = vmin.xlane.f32.xlu1 %v553_v56 }
 0x20b   : > { %v512_v57 = vpop.xlane.xlu1 %511 }
 0x20c   : > { %vm540_vm4 = vcmp.eq.f32.partialorder %v2655_v23, %v512_v57 }
 0x20d   : > { %v556_v58 = vsel %vm540_vm4, %v2697_v52, 128.0 }
 0x20e   : > { %575 = vmin.xlane.f32.xlu1 %v556_v58 }
 0x20f   : > { %v510_v59 = vpop.xlane.xlu1 %509 }
 0x210   : > { %vm539_vm5 = vcmp.eq.f32.partialorder %v2657_v25, %v510_v59 }
 0x211   : > { %v555_v60 = vsel %vm539_vm5, %v2697_v52, 128.0 }
 0x212   : > { %573 = vmin.xlane.f32.xlu1 %v555_v60 }
 0x213   : > { %v516_v61 = vpop.xlane.xlu1 %515 }
 0x214   : > { %vm542_vm6 = vcmp.eq.f32.partialorder %v2661_v27, %v516_v61 }
 0x215   : > { %v558_v62 = vsel %vm542_vm6, %v2697_v52, 128.0 }
 0x216   : > { %579 = vmin.xlane.f32.xlu1 %v558_v62 }
 0x217   : > { %v514_v63 = vpop.xlane.xlu1 %513 }
 0x218   : > { %vm541_vm7 = vcmp.eq.f32.partialorder %v2663_v29, %v514_v63 }
 0x219   : > { %v557_v0 = vsel %vm541_vm7, %v2697_v52, 128.0 }
 0x21a   : > { %577 = vmin.xlane.f32.xlu1 %v557_v0 }
 0x21b   : > { %v520_v2 = vpop.xlane.xlu1 %519 }
 0x21c   : > { %vm544_vm8 = vcmp.eq.f32.partialorder %v2667_v31, %v520_v2 }
 0x21d   : > { %v560_v3 = vsel %vm544_vm8, %v2697_v52, 128.0 }
 0x21e   : > { %583 = vmin.xlane.f32.xlu1 %v560_v3 }
 0x21f   : > { %v518_v4 = vpop.xlane.xlu1 %517 }
 0x220   : > { %vm543_vm9 = vcmp.eq.f32.partialorder %v2669_v33, %v518_v4 }
 0x221   : > { %v559_v5 = vsel %vm543_vm9, %v2697_v52, 128.0 }
 0x222   : > { %581 = vmin.xlane.f32.xlu1 %v559_v5 }
 0x223   : > { %v524_v6 = vpop.xlane.xlu1 %523 }
 0x224   : > { %vm546_vm10 = vcmp.eq.f32.partialorder %v2673_v35, %v524_v6 }
 0x225   : > { %v562_v7 = vsel %vm546_vm10, %v2697_v52, 128.0 }
 0x226   : > { %587 = vmin.xlane.f32.xlu1 %v562_v7 }
 0x227   : > { %v522_v8 = vpop.xlane.xlu1 %521 }
 0x228   : > { %vm545_vm11 = vcmp.eq.f32.partialorder %v2675_v37, %v522_v8 }
 0x229   : > { %v561_v9 = vsel %vm545_vm11, %v2697_v52, 128.0 }
 0x22a   : > { %585 = vmin.xlane.f32.xlu1 %v561_v9 }
 0x22b   : > { %v528_v10 = vpop.xlane.xlu1 %527 }
 0x22c   : > { %vm548_vm13 = vcmp.eq.f32.partialorder %v2679_v39, %v528_v10 }
 0x22d   : > { %v564_v15 = vsel %vm548_vm13, %v2697_v52, 128.0 }
 0x22f   : > { %v526_v11 = vpop.xlane.xlu1 %525 }
 0x230   : > { %vm547_vm12 = vcmp.eq.f32.partialorder %v2681_v41, %v526_v11 }
 0x231   : > { %v563_v12 = vsel %vm547_vm12, %v2697_v52, 128.0 }
 0x232   : > { %589 = vmin.xlane.f32.xlu1 %v563_v12 }
 0x233   : > { %v532_v13 = vpop.xlane.xlu1 %531 }
 0x234   : > { %vm550_vm14 = vcmp.eq.f32.partialorder %v2685_v43, %v532_v13 }
 0x235   : > { %v566_v14 = vsel %vm550_vm14, %v2697_v52, 128.0 }
 0x236   : > { %595 = vmin.xlane.f32.xlu0 %v566_v14  ;;  %591 = vmin.xlane.f32.xlu1 %v564_v15 }
 0x237   : > { %v530_v16 = vpop.xlane.xlu1 %529 }
 0x238   : > { %vm549_vm15 = vcmp.eq.f32.partialorder %v2687_v45, %v530_v16 }
 0x239   : > { %v565_v17 = vsel %vm549_vm15, %v2697_v52, 128.0 }
 0x23a   : > { %593 = vmin.xlane.f32.xlu1 %v565_v17 }
 0x23c   : > { %v534_v18 = vpop.xlane.xlu1 %533 }
 0x23d   : > { %vm551_vm2 = vcmp.eq.f32.partialorder %v2693_v49, %v534_v18 }
 0x23e   : > { %v567_v20 = vsel %vm551_vm2, %v2697_v52, 128.0 }
 0x23f   : > { %597 = vmin.xlane.f32.xlu1 %v567_v20 }
 0x240   : > { %v536_v22 = vpop.xlane.xlu1 %535 }
 0x241   : > { %vm552_vm3 = vcmp.eq.f32.partialorder %v2691_v47, %v536_v22 }
 0x242   : > { %v568_v24 = vsel %vm552_vm3, %v2697_v52, 128.0 }
 0x243   : > { %599 = vmin.xlane.f32.xlu0 %v568_v24 }
 0x293   : > { %v572_v26 = vpop.xlane.xlu1 %571 }
 0x294   : > { %vm602_vm4 = vcmp.eq.f32.partialorder %v2697_v52, %v572_v26 }
 0x295   : > { %v2735_v28 = vsel %vm602_vm4, -inf, %v2649_v19 }
 0x296   : > { %738 = vmax.xlane.f32.xlu0 %v2735_v28 }
 0x297   : > { %v570_v30 = vpop.xlane.xlu1 %569 }
 0x298   : > { %vm601_vm5 = vcmp.eq.f32.partialorder %v2697_v52, %v570_v30 }
 0x299   : > { %v2740_v32 = vsel %vm601_vm5, -inf, %v2651_v21  ;;  %vm2287_vm6 = vmpackc.low %vm602_vm4, %vm601_vm5 }
 0x29a   : > { %736 = vmax.xlane.f32.xlu1 %v2740_v32  ;;  %2288 = vmatpush3.bf16.xpose.msk.msra.mxu1 %vm2287_vm6, %v2526_v34 }
 0x29b   : > { %v576_v36 = vpop.xlane.xlu1 %575  ;;  %2289 = vmatprep.subr.bf16.mxu1 %v2525_v1 }
 0x29c   : > { %vm604_vm7 = vcmp.eq.f32.partialorder %v2697_v52, %v576_v36 }
 0x29d   : > { %v2747_v19 = vsel %vm604_vm7, -inf, %v2655_v23 }
 0x29e   : > { %742 = vmax.xlane.f32.xlu0 %v2747_v19 }
 0x29f   : > { %v574_v38 = vpop.xlane.xlu1 %573 }
 0x2a0   : > { %vm603_vm8 = vcmp.eq.f32.partialorder %v2697_v52, %v574_v38 }
 0x2a1   : > { %vm2290_vm9 = vmpackc.low %vm604_vm7, %vm603_vm8  ;;  %v2752_v21 = vsel %vm603_vm8, -inf, %v2657_v25 }
 0x2a2   : > { %740 = vmax.xlane.f32.xlu1 %v2752_v21  ;;  %2291 = vmatpush3.bf16.xpose.msk.msra.mxu1 %vm2290_vm9, %v2526_v34 }
 0x2a3   : > { %v580_v40 = vpop.xlane.xlu1 %579  ;;  %2292 = vmatprep.subr.bf16.mxu1 %v2525_v1 }
 0x2a4   : > { %vm606_vm10 = vcmp.eq.f32.partialorder %v2697_v52, %v580_v40 }
 0x2a5   : > { %v2759_v23 = vsel %vm606_vm10, -inf, %v2661_v27 }
 0x2a6   : > { %746 = vmax.xlane.f32.xlu0 %v2759_v23 }
 0x2a7   : > { %v578_v42 = vpop.xlane.xlu1 %577 }
 0x2a8   : > { %vm605_vm11 = vcmp.eq.f32.partialorder %v2697_v52, %v578_v42 }
 0x2a9   : > { %vm2293_vm12 = vmpackc.low %vm606_vm10, %vm605_vm11  ;;  %v2764_v25 = vsel %vm605_vm11, -inf, %v2663_v29 }
 0x2aa   : > { %744 = vmax.xlane.f32.xlu1 %v2764_v25  ;;  %2294 = vmatpush3.bf16.xpose.msk.msra.mxu1 %vm2293_vm12, %v2526_v34 }
 0x2ab   : > { %v584_v44 = vpop.xlane.xlu1 %583  ;;  %2295 = vmatprep.subr.bf16.mxu1 %v2525_v1 }
 0x2ac   : > { %vm608_vm13 = vcmp.eq.f32.partialorder %v2697_v52, %v584_v44 }
 0x2ad   : > { %v2771_v27 = vsel %vm608_vm13, -inf, %v2667_v31 }
 0x2ae   : > { %750 = vmax.xlane.f32.xlu0 %v2771_v27 }
 0x2af   : > { %v582_v46 = vpop.xlane.xlu1 %581 }
 0x2b0   : > { %vm607_vm14 = vcmp.eq.f32.partialorder %v2697_v52, %v582_v46 }
 0x2b1   : > { %vm2296_vm15 = vmpackc.low %vm608_vm13, %vm607_vm14  ;;  %v2776_v29 = vsel %vm607_vm14, -inf, %v2669_v33 }
 0x2b2   : > { %748 = vmax.xlane.f32.xlu1 %v2776_v29  ;;  %2297 = vmatpush3.bf16.xpose.msk.msra.mxu1 %vm2296_vm15, %v2526_v34 }
 0x2b3   : > { %v588_v48 = vpop.xlane.xlu1 %587  ;;  %2298 = vmatprep.subr.bf16.mxu1 %v2525_v1 }
 0x2b4   : > { %vm610_vm2 = vcmp.eq.f32.partialorder %v2697_v52, %v588_v48 }
 0x2b5   : > { %v2783_v31 = vsel %vm610_vm2, -inf, %v2673_v35 }
 0x2b6   : > { %754 = vmax.xlane.f32.xlu0 %v2783_v31 }
 0x2b7   : > { %v586_v50 = vpop.xlane.xlu1 %585 }
 0x2b8   : > { %vm609_vm3 = vcmp.eq.f32.partialorder %v2697_v52, %v586_v50 }
 0x2b9   : > { %vm2299_vm4 = vmpackc.low %vm610_vm2, %vm609_vm3  ;;  %v2788_v33 = vsel %vm609_vm3, -inf, %v2675_v37 }
 0x2ba   : > { %752 = vmax.xlane.f32.xlu1 %v2788_v33  ;;  %2300 = vmatpush3.bf16.xpose.msk.msra.mxu1 %vm2299_vm4, %v2526_v34 }
 0x2bb   : > { %2301 = vmatprep.subr.bf16.mxu1 %v2525_v1 }
 0x2bf   : > { %v590_v51 = vpop.xlane.xlu1 %589 }
 0x2c0   : > { %vm611_vm5 = vcmp.eq.f32.partialorder %v2697_v52, %v590_v51 }
 0x2c1   : > { %v2795_v35 = vsel %vm611_vm5, -inf, %v2681_v41 }
 0x2c2   : > { %756 = vmax.xlane.f32.xlu1 %v2795_v35 }
 0x2c3   : > { %v596_v53 = vpop.xlane.xlu0 %595  ;;  %v592_v54 = vpop.xlane.xlu1 %591 }
 0x2c4   : > { %vm612_vm6 = vcmp.eq.f32.partialorder %v2697_v52, %v592_v54  ;;  %vm614_vm8 = vcmp.eq.f32.partialorder %v2697_v52, %v596_v53 }
 0x2c5   : > { %vm2302_vm7 = vmpackc.low %vm612_vm6, %vm611_vm5  ;;  %v2800_v37 = vsel %vm612_vm6, -inf, %v2679_v39  ;;  %v2808_v41 = vsel %vm614_vm8, -inf, %v2685_v43 }
 0x2c6   : > { %758 = vmax.xlane.f32.xlu0 %v2800_v37  ;;  %2303 = vmatpush3.bf16.xpose.msk.msra.mxu1 %vm2302_vm7, %v2526_v34 }
 0x2c7   : > { %v594_v55 = vpop.xlane.xlu1 %593  ;;  %2304 = vmatprep.subr.bf16.mxu1 %v2525_v1 }
 0x2c8   : > { %vm613_vm9 = vcmp.eq.f32.partialorder %v2697_v52, %v594_v55 }
 0x2c9   : > { %v2811_v56 = vsel %vm613_vm9, -inf, %v2687_v45  ;;  %vm2305_vm10 = vmpackc.low %vm614_vm8, %vm613_vm9 }
 0x2ca   : > { %762 = vmax.xlane.f32.xlu0 %v2808_v41  ;;  %760 = vmax.xlane.f32.xlu1 %v2811_v56 }
 0x2cc   : > { %v598_v39 = vpop.xlane.xlu1 %597 }
 0x2cd   : > { %vm615_vm11 = vcmp.eq.f32.partialorder %v2697_v52, %v598_v39 }
 0x2ce   : > { %2306 = vmatpush3.bf16.xpose.msk.msra.mxu1 %vm2305_vm10, %v2526_v34  ;;  %v2818_v57 = vsel %vm615_vm11, -inf, %v2693_v49 }
 0x2cf   : > { %764 = vmax.xlane.f32.xlu1 %v2818_v57  ;;  %2307 = vmatprep.subr.bf16.mxu1 %v2525_v1 }
 0x2d0   : > { %v600_v43 = vpop.xlane.xlu0 %599 }
 0x2d1   : > { %vm616_vm12 = vcmp.eq.f32.partialorder %v2697_v52, %v600_v43 }
 0x2d2   : > { %v2824_v45 = vsel %vm616_vm12, -inf, %v2691_v47  ;;  %vm2308_vm13 = vmpackc.low %vm616_vm12, %vm615_vm11 }
 0x2d3   : > { %766 = vmax.xlane.f32.xlu0 %v2824_v45 }
 0x2d6   : > { %2309 = vmatpush3.bf16.xpose.msk.msra.mxu1 %vm2308_vm13, %v2526_v34 }
 0x2d7   : > { %2334 = vmatprep.subr.bf16.mxu1 %v2525_v1 }
 0x323   : > { %v739_v58 = vpop.xlane.xlu0 %738 }
 0x324   : > { %vm769_vm14 = vcmp.eq.f32.partialorder %v2735_v28, %v739_v58 }
 0x325   : > { %v2831_v49 = vsel %vm769_vm14, -inf, %v2735_v28 }
 0x326   : > { %802 = vmax.xlane.f32.xlu0 %v2831_v49 }
 0x327   : > { %v737_v59 = vpop.xlane.xlu1 %736 }
 0x328   : > { %vm768_vm15 = vcmp.eq.f32.partialorder %v2740_v32, %v737_v59 }
 0x329   : > { %v2836_v47 = vsel %vm768_vm15, -inf, %v2740_v32 }
 0x32a   : > { %800 = vmax.xlane.f32.xlu1 %v2836_v47 }
 0x32b   : > { %v743_v60 = vpop.xlane.xlu0 %742 }
 0x32c   : > { %vm771_vm2 = vcmp.eq.f32.partialorder %v2747_v19, %v743_v60 }
 0x32d   : > { %v2841_v61 = vsel %vm771_vm2, -inf, %v2747_v19 }
 0x32e   : > { %806 = vmax.xlane.f32.xlu0 %v2841_v61 }
 0x32f   : > { %v741_v62 = vpop.xlane.xlu1 %740 }
 0x330   : > { %vm770_vm3 = vcmp.eq.f32.partialorder %v2752_v21, %v741_v62 }
 0x331   : > { %v2846_v63 = vsel %vm770_vm3, -inf, %v2752_v21 }
 0x332   : > { %804 = vmax.xlane.f32.xlu1 %v2846_v63 }
 0x333   : > { %v747_v0 = vpop.xlane.xlu0 %746 }
 0x334   : > { %vm773_vm4 = vcmp.eq.f32.partialorder %v2759_v23, %v747_v0 }
 0x335   : > { %v2851_v2 = vsel %vm773_vm4, -inf, %v2759_v23 }
 0x336   : > { %810 = vmax.xlane.f32.xlu0 %v2851_v2 }
 0x337   : > { %v745_v3 = vpop.xlane.xlu1 %744 }
 0x338   : > { %vm772_vm5 = vcmp.eq.f32.partialorder %v2764_v25, %v745_v3 }
 0x339   : > { %v2856_v4 = vsel %vm772_vm5, -inf, %v2764_v25 }
 0x33a   : > { %808 = vmax.xlane.f32.xlu1 %v2856_v4 }
 0x33b   : > { %v751_v5 = vpop.xlane.xlu0 %750 }
 0x33c   : > { %vm775_vm6 = vcmp.eq.f32.partialorder %v2771_v27, %v751_v5 }
 0x33d   : > { %v2861_v6 = vsel %vm775_vm6, -inf, %v2771_v27 }
 0x33e   : > { %814 = vmax.xlane.f32.xlu0 %v2861_v6 }
 0x33f   : > { %v749_v7 = vpop.xlane.xlu1 %748 }
 0x340   : > { %vm774_vm7 = vcmp.eq.f32.partialorder %v2776_v29, %v749_v7 }
 0x341   : > { %v2866_v8 = vsel %vm774_vm7, -inf, %v2776_v29 }
 0x342   : > { %812 = vmax.xlane.f32.xlu1 %v2866_v8 }
 0x343   : > { %v755_v9 = vpop.xlane.xlu0 %754 }
 0x344   : > { %vm777_vm8 = vcmp.eq.f32.partialorder %v2783_v31, %v755_v9 }
 0x345   : > { %v2871_v10 = vsel %vm777_vm8, -inf, %v2783_v31 }
 0x346   : > { %818 = vmax.xlane.f32.xlu0 %v2871_v10 }
 0x347   : > { %v753_v11 = vpop.xlane.xlu1 %752 }
 0x348   : > { %vm776_vm9 = vcmp.eq.f32.partialorder %v2788_v33, %v753_v11 }
 0x349   : > { %v2876_v12 = vsel %vm776_vm9, -inf, %v2788_v33 }
 0x34a   : > { %816 = vmax.xlane.f32.xlu1 %v2876_v12 }
 0x34f   : > { %v757_v13 = vpop.xlane.xlu1 %756 }
 0x350   : > { %vm778_vm10 = vcmp.eq.f32.partialorder %v2795_v35, %v757_v13 }
 0x351   : > { %v2881_v14 = vsel %vm778_vm10, -inf, %v2795_v35 }
 0x352   : > { %820 = vmax.xlane.f32.xlu1 %v2881_v14 }
 0x353   : > { %v759_v15 = vpop.xlane.xlu0 %758 }
 0x354   : > { %vm779_vm11 = vcmp.eq.f32.partialorder %v2800_v37, %v759_v15 }
 0x355   : > { %v2886_v16 = vsel %vm779_vm11, -inf, %v2800_v37 }
 0x356   : > { %822 = vmax.xlane.f32.xlu0 %v2886_v16 }
 0x357   : > { %v763_v17 = vpop.xlane.xlu0 %762  ;;  %v761_v18 = vpop.xlane.xlu1 %760 }
 0x358   : > { %vm781_vm12 = vcmp.eq.f32.partialorder %v2808_v41, %v763_v17  ;;  %vm780_vm13 = vcmp.eq.f32.partialorder %v2811_v56, %v761_v18 }
 0x359   : > { %v2892_v20 = vsel %vm781_vm12, -inf, %v2808_v41  ;;  %v2895_v22 = vsel %vm780_vm13, -inf, %v2811_v56 }
 0x35a   : > { %826 = vmax.xlane.f32.xlu0 %v2892_v20  ;;  %824 = vmax.xlane.f32.xlu1 %v2895_v22 }
 0x35c   : > { %v765_v24 = vpop.xlane.xlu1 %764 }
 0x35d   : > { %vm782_vm14 = vcmp.eq.f32.partialorder %v2818_v57, %v765_v24 }
 0x35e   : > { %v2901_v26 = vsel %vm782_vm14, -inf, %v2818_v57 }
 0x35f   : > { %828 = vmax.xlane.f32.xlu1 %v2901_v26 }
 0x360   : > { %v767_v28 = vpop.xlane.xlu0 %766 }
 0x361   : > { %vm783_vm15 = vcmp.eq.f32.partialorder %v2824_v45, %v767_v28 }
 0x362   : > { %v2906_v30 = vsel %vm783_vm15, -inf, %v2824_v45 }
 0x363   : > { %830 = vmax.xlane.f32.xlu0 %v2906_v30 }
 0x3b3   : > { %v803_v32 = vpop.xlane.xlu0 %802 }
 0x3b4   : > { %vm833_vm2 = vcmp.eq.f32.partialorder %v2831_v49, %v803_v32 }
 0x3b5   : > { %v849_v36 = vsel %vm833_vm2, %v2697_v52, 128.0 }
 0x3b6   : > { %866 = vmin.xlane.f32.xlu0 %v849_v36 }
 0x3b7   : > { %v801_v19 = vpop.xlane.xlu1 %800 }
 0x3b8   : > { %vm832_vm3 = vcmp.eq.f32.partialorder %v2836_v47, %v801_v19 }
 0x3b9   : > { %v848_v38 = vsel %vm832_vm3, %v2697_v52, 128.0 }
 0x3ba   : > { %864 = vmin.xlane.f32.xlu1 %v848_v38 }
 0x3bb   : > { %v807_v21 = vpop.xlane.xlu0 %806 }
 0x3bc   : > { %vm835_vm4 = vcmp.eq.f32.partialorder %v2841_v61, %v807_v21 }
 0x3bd   : > { %v851_v40 = vsel %vm835_vm4, %v2697_v52, 128.0 }
 0x3be   : > { %870 = vmin.xlane.f32.xlu0 %v851_v40 }
 0x3bf   : > { %v805_v23 = vpop.xlane.xlu1 %804 }
 0x3c0   : > { %vm834_vm5 = vcmp.eq.f32.partialorder %v2846_v63, %v805_v23 }
 0x3c1   : > { %v850_v42 = vsel %vm834_vm5, %v2697_v52, 128.0 }
 0x3c2   : > { %868 = vmin.xlane.f32.xlu1 %v850_v42 }
 0x3c3   : > { %v811_v25 = vpop.xlane.xlu0 %810 }
 0x3c4   : > { %vm837_vm6 = vcmp.eq.f32.partialorder %v2851_v2, %v811_v25 }
 0x3c5   : > { %v853_v44 = vsel %vm837_vm6, %v2697_v52, 128.0 }
 0x3c6   : > { %874 = vmin.xlane.f32.xlu0 %v853_v44 }
 0x3c7   : > { %v809_v27 = vpop.xlane.xlu1 %808 }
 0x3c8   : > { %vm836_vm7 = vcmp.eq.f32.partialorder %v2856_v4, %v809_v27 }
 0x3c9   : > { %v852_v46 = vsel %vm836_vm7, %v2697_v52, 128.0 }
 0x3ca   : > { %872 = vmin.xlane.f32.xlu1 %v852_v46 }
 0x3cb   : > { %v815_v29 = vpop.xlane.xlu0 %814 }
 0x3cc   : > { %vm839_vm8 = vcmp.eq.f32.partialorder %v2861_v6, %v815_v29 }
 0x3cd   : > { %v855_v48 = vsel %vm839_vm8, %v2697_v52, 128.0 }
 0x3ce   : > { %878 = vmin.xlane.f32.xlu0 %v855_v48 }
 0x3cf   : > { %v813_v31 = vpop.xlane.xlu1 %812 }
 0x3d0   : > { %vm838_vm9 = vcmp.eq.f32.partialorder %v2866_v8, %v813_v31 }
 0x3d1   : > { %v854_v50 = vsel %vm838_vm9, %v2697_v52, 128.0 }
 0x3d2   : > { %876 = vmin.xlane.f32.xlu1 %v854_v50 }
 0x3d3   : > { %v819_v33 = vpop.xlane.xlu0 %818 }
 0x3d4   : > { %vm841_vm10 = vcmp.eq.f32.partialorder %v2871_v10, %v819_v33 }
 0x3d5   : > { %v857_v51 = vsel %vm841_vm10, %v2697_v52, 128.0 }
 0x3d6   : > { %882 = vmin.xlane.f32.xlu0 %v857_v51 }
 0x3d7   : > { %v817_v35 = vpop.xlane.xlu1 %816 }
 0x3d8   : > { %vm840_vm11 = vcmp.eq.f32.partialorder %v2876_v12, %v817_v35 }
 0x3d9   : > { %v856_v53 = vsel %vm840_vm11, %v2697_v52, 128.0 }
 0x3da   : > { %880 = vmin.xlane.f32.xlu1 %v856_v53 }
 0x3df   : > { %v821_v54 = vpop.xlane.xlu1 %820 }
 0x3e0   : > { %vm842_vm12 = vcmp.eq.f32.partialorder %v2881_v14, %v821_v54 }
 0x3e1   : > { %v858_v37 = vsel %vm842_vm12, %v2697_v52, 128.0 }
 0x3e2   : > { %884 = vmin.xlane.f32.xlu1 %v858_v37 }
 0x3e3   : > { %v823_v55 = vpop.xlane.xlu0 %822 }
 0x3e4   : > { %vm843_vm13 = vcmp.eq.f32.partialorder %v2886_v16, %v823_v55 }
 0x3e5   : > { %v859_v41 = vsel %vm843_vm13, %v2697_v52, 128.0 }
 0x3e6   : > { %886 = vmin.xlane.f32.xlu0 %v859_v41 }
 0x3e7   : > { %v827_v56 = vpop.xlane.xlu0 %826  ;;  %v825_v39 = vpop.xlane.xlu1 %824 }
 0x3e8   : > { %vm844_vm14 = vcmp.eq.f32.partialorder %v2895_v22, %v825_v39  ;;  %vm845_vm15 = vcmp.eq.f32.partialorder %v2892_v20, %v827_v56 }
 0x3e9   : > { %v861_v57 = vsel %vm845_vm15, %v2697_v52, 128.0  ;;  %v860_v43 = vsel %vm844_vm14, %v2697_v52, 128.0 }
 0x3ea   : > { %890 = vmin.xlane.f32.xlu0 %v861_v57  ;;  %888 = vmin.xlane.f32.xlu1 %v860_v43 }
 0x3ec   : > { %v829_v45 = vpop.xlane.xlu1 %828 }
 0x3ed   : > { %vm846_vm2 = vcmp.eq.f32.partialorder %v2901_v26, %v829_v45 }
 0x3ee   : > { %v862_v58 = vsel %vm846_vm2, %v2697_v52, 128.0 }
 0x3ef   : > { %892 = vmin.xlane.f32.xlu1 %v862_v58 }
 0x3f0   : > { %v831_v59 = vpop.xlane.xlu0 %830 }
 0x3f1   : > { %vm847_vm3 = vcmp.eq.f32.partialorder %v2906_v30, %v831_v59 }
 0x3f2   : > { %v863_v60 = vsel %vm847_vm3, %v2697_v52, 128.0 }
 0x3f3   : > { %894 = vmin.xlane.f32.xlu0 %v863_v60 }
 0x443   : > { %v867_v62 = vpop.xlane.xlu0 %866 }
 0x444   : > { %vm897_vm4 = vcmp.eq.f32.partialorder %v2697_v52, %v867_v62 }
 0x445   : > { %v2943_v0 = vsel %vm897_vm4, -inf, %v2831_v49 }
 0x446   : > { %1034 = vmax.xlane.f32.xlu0 %v2943_v0 }
 0x447   : > { %v865_v3 = vpop.xlane.xlu1 %864 }
 0x448   : > { %vm896_vm5 = vcmp.eq.f32.partialorder %v2697_v52, %v865_v3 }
 0x449   : > { %vm2311_vm6 = vmpackc.low %vm897_vm4, %vm896_vm5  ;;  %v2948_v5 = vsel %vm896_vm5, -inf, %v2836_v47 }
 0x44a   : > { %1032 = vmax.xlane.f32.xlu1 %v2948_v5  ;;  %2312 = vmatpush3.bf16.xpose.msk.msra.mxu0 %vm2311_vm6, %v2526_v34 }
 0x44b   : > { %v871_v7 = vpop.xlane.xlu0 %870  ;;  %2313 = vmatprep.subr.bf16.mxu0 %v2525_v1 }
 0x44c   : > { %vm899_vm7 = vcmp.eq.f32.partialorder %v2697_v52, %v871_v7 }
 0x44d   : > { %v2955_v49 = vsel %vm899_vm7, -inf, %v2841_v61 }
 0x44e   : > { %1038 = vmax.xlane.f32.xlu0 %v2955_v49 }
 0x44f   : > { %v869_v9 = vpop.xlane.xlu1 %868 }
 0x450   : > { %vm898_vm8 = vcmp.eq.f32.partialorder %v2697_v52, %v869_v9 }
 0x451   : > { %vm2314_vm9 = vmpackc.low %vm899_vm7, %vm898_vm8  ;;  %v2960_v47 = vsel %vm898_vm8, -inf, %v2846_v63 }
 0x452   : > { %1036 = vmax.xlane.f32.xlu1 %v2960_v47  ;;  %2315 = vmatpush3.bf16.xpose.msk.msra.mxu0 %vm2314_vm9, %v2526_v34 }
 0x453   : > { %v875_v11 = vpop.xlane.xlu0 %874  ;;  %2316 = vmatprep.subr.bf16.mxu0 %v2525_v1 }
 0x454   : > { %vm901_vm10 = vcmp.eq.f32.partialorder %v2697_v52, %v875_v11 }
 0x455   : > { %v2967_v61 = vsel %vm901_vm10, -inf, %v2851_v2 }
 0x456   : > { %1042 = vmax.xlane.f32.xlu0 %v2967_v61 }
 0x457   : > { %v873_v13 = vpop.xlane.xlu1 %872 }
 0x458   : > { %vm900_vm11 = vcmp.eq.f32.partialorder %v2697_v52, %v873_v13 }
 0x459   : > { %vm2317_vm12 = vmpackc.low %vm901_vm10, %vm900_vm11  ;;  %v2972_v63 = vsel %vm900_vm11, -inf, %v2856_v4 }
 0x45a   : > { %1040 = vmax.xlane.f32.xlu1 %v2972_v63  ;;  %2318 = vmatpush3.bf16.xpose.msk.msra.mxu0 %vm2317_vm12, %v2526_v34 }
 0x45b   : > { %v879_v15 = vpop.xlane.xlu0 %878  ;;  %2319 = vmatprep.subr.bf16.mxu0 %v2525_v1 }
 0x45c   : > { %vm903_vm13 = vcmp.eq.f32.partialorder %v2697_v52, %v879_v15 }
 0x45d   : > { %v2979_v2 = vsel %vm903_vm13, -inf, %v2861_v6 }
 0x45e   : > { %1046 = vmax.xlane.f32.xlu0 %v2979_v2 }
 0x45f   : > { %v877_v17 = vpop.xlane.xlu1 %876 }
 0x460   : > { %vm902_vm14 = vcmp.eq.f32.partialorder %v2697_v52, %v877_v17 }
 0x461   : > { %vm2320_vm15 = vmpackc.low %vm903_vm13, %vm902_vm14  ;;  %v2984_v4 = vsel %vm902_vm14, -inf, %v2866_v8 }
 0x462   : > { %1044 = vmax.xlane.f32.xlu1 %v2984_v4  ;;  %2321 = vmatpush3.bf16.xpose.msk.msra.mxu0 %vm2320_vm15, %v2526_v34 }
 0x463   : > { %v883_v18 = vpop.xlane.xlu0 %882  ;;  %2322 = vmatprep.subr.bf16.mxu0 %v2525_v1 }
 0x464   : > { %vm905_vm2 = vcmp.eq.f32.partialorder %v2697_v52, %v883_v18  ;;  %v3134_v18 = vld [vmem:[%s2624_s11] sm:$0xf] }
 0x465   : > { %v2991_v6 = vsel %vm905_vm2, -inf, %v2871_v10 }
 0x466   : > { %1050 = vmax.xlane.f32.xlu0 %v2991_v6 }
 0x467   : > { %v881_v24 = vpop.xlane.xlu1 %880 }
 0x468   : > { %vm904_vm3 = vcmp.eq.f32.partialorder %v2697_v52, %v881_v24 }
 0x469   : > { %vm2323_vm4 = vmpackc.low %vm905_vm2, %vm904_vm3  ;;  %v2996_v8 = vsel %vm904_vm3, -inf, %v2876_v12 }
 0x46a   : > { %1048 = vmax.xlane.f32.xlu1 %v2996_v8  ;;  %2324 = vmatpush3.bf16.xpose.msk.msra.mxu0 %vm2323_vm4, %v2526_v34 }
 0x46b   : > { %2325 = vmatprep.subr.bf16.mxu0 %v2525_v1 }
 0x46f   : > { %v885_v28 = vpop.xlane.xlu1 %884 }
 0x470   : > { %vm906_vm5 = vcmp.eq.f32.partialorder %v2697_v52, %v885_v28 }
 0x471   : > { %v3003_v10 = vsel %vm906_vm5, -inf, %v2881_v14 }
 0x472   : > { %1052 = vmax.xlane.f32.xlu1 %v3003_v10 }
 0x473   : > { %v887_v32 = vpop.xlane.xlu0 %886 }
 0x474   : > { %vm907_vm6 = vcmp.eq.f32.partialorder %v2697_v52, %v887_v32 }
 0x475   : > { %vm2326_vm7 = vmpackc.low %vm907_vm6, %vm906_vm5  ;;  %v3008_v12 = vsel %vm907_vm6, -inf, %v2886_v16 }
 0x476   : > { %1054 = vmax.xlane.f32.xlu0 %v3008_v12  ;;  %2327 = vmatpush3.bf16.xpose.msk.msra.mxu0 %vm2326_vm7, %v2526_v34 }
 0x477   : > { %v891_v36 = vpop.xlane.xlu0 %890  ;;  %v889_v19 = vpop.xlane.xlu1 %888  ;;  %2328 = vmatprep.subr.bf16.mxu0 %v2525_v1 }
 0x478   : > { %vm909_vm8 = vcmp.eq.f32.partialorder %v2697_v52, %v891_v36  ;;  %vm908_vm9 = vcmp.eq.f32.partialorder %v2697_v52, %v889_v19 }
 0x479   : > { %v3016_v14 = vsel %vm909_vm8, -inf, %v2892_v20  ;;  %v3019_v38 = vsel %vm908_vm9, -inf, %v2895_v22  ;;  %vm2329_vm10 = vmpackc.low %vm909_vm8, %vm908_vm9 }
 0x47a   : > { %1058 = vmax.xlane.f32.xlu0 %v3016_v14  ;;  %1056 = vmax.xlane.f32.xlu1 %v3019_v38 }
 0x47c   : > { %v893_v16 = vpop.xlane.xlu1 %892 }
 0x47d   : > { %vm910_vm11 = vcmp.eq.f32.partialorder %v2697_v52, %v893_v16 }
 0x47e   : > { %2330 = vmatpush3.bf16.xpose.msk.msra.mxu0 %vm2329_vm10, %v2526_v34  ;;  %v3026_v21 = vsel %vm910_vm11, -inf, %v2901_v26 }
 0x47f   : > { %1060 = vmax.xlane.f32.xlu1 %v3026_v21  ;;  %2331 = vmatprep.subr.bf16.mxu0 %v2525_v1 }
 0x480   : > { %v895_v20 = vpop.xlane.xlu0 %894 }
 0x481   : > { %vm911_vm12 = vcmp.eq.f32.partialorder %v2697_v52, %v895_v20 }
 0x482   : > { %v3032_v22 = vsel %vm911_vm12, -inf, %v2906_v30  ;;  %vm2332_vm13 = vmpackc.low %vm911_vm12, %vm910_vm11 }
 0x483   : > { %1062 = vmax.xlane.f32.xlu0 %v3032_v22 }
 0x486   : > { %2333 = vmatpush3.bf16.xpose.msk.msra.mxu0 %vm2332_vm13, %v2526_v34 }
 0x487   : > { %2358 = vmatprep.subr.bf16.mxu0 %v2525_v1 }
 0x4d3   : > { %v1035_v40 = vpop.xlane.xlu0 %1034 }
 0x4d4   : > { %vm1065_vm14 = vcmp.eq.f32.partialorder %v2943_v0, %v1035_v40 }
 0x4d5   : > { %v3039_v26 = vsel %vm1065_vm14, -inf, %v2943_v0 }
 0x4d6   : > { %1098 = vmax.xlane.f32.xlu0 %v3039_v26 }
 0x4d7   : > { %v1033_v23 = vpop.xlane.xlu1 %1032 }
 0x4d8   : > { %vm1064_vm15 = vcmp.eq.f32.partialorder %v2948_v5, %v1033_v23 }
 0x4d9   : > { %v3044_v30 = vsel %vm1064_vm15, -inf, %v2948_v5 }
 0x4da   : > { %1096 = vmax.xlane.f32.xlu1 %v3044_v30 }
 0x4db   : > { %v1039_v42 = vpop.xlane.xlu0 %1038 }
 0x4dc   : > { %vm1067_vm2 = vcmp.eq.f32.partialorder %v2955_v49, %v1039_v42 }
 0x4dd   : > { %v3049_v25 = vsel %vm1067_vm2, -inf, %v2955_v49 }
 0x4de   : > { %1102 = vmax.xlane.f32.xlu0 %v3049_v25 }
 0x4df   : > { %v1037_v44 = vpop.xlane.xlu1 %1036 }
 0x4e0   : > { %vm1066_vm3 = vcmp.eq.f32.partialorder %v2960_v47, %v1037_v44 }
 0x4e1   : > { %v3054_v27 = vsel %vm1066_vm3, -inf, %v2960_v47 }
 0x4e2   : > { %1100 = vmax.xlane.f32.xlu1 %v3054_v27 }
 0x4e3   : > { %v1043_v46 = vpop.xlane.xlu0 %1042 }
 0x4e4   : > { %vm1069_vm4 = vcmp.eq.f32.partialorder %v2967_v61, %v1043_v46 }
 0x4e5   : > { %v3059_v29 = vsel %vm1069_vm4, -inf, %v2967_v61 }
 0x4e6   : > { %1106 = vmax.xlane.f32.xlu0 %v3059_v29 }
 0x4e7   : > { %v1041_v48 = vpop.xlane.xlu1 %1040 }
 0x4e8   : > { %vm1068_vm5 = vcmp.eq.f32.partialorder %v2972_v63, %v1041_v48 }
 0x4e9   : > { %v3064_v31 = vsel %vm1068_vm5, -inf, %v2972_v63 }
 0x4ea   : > { %1104 = vmax.xlane.f32.xlu1 %v3064_v31 }
 0x4eb   : > { %v1047_v50 = vpop.xlane.xlu0 %1046 }
 0x4ec   : > { %vm1071_vm6 = vcmp.eq.f32.partialorder %v2979_v2, %v1047_v50 }
 0x4ed   : > { %v3069_v33 = vsel %vm1071_vm6, -inf, %v2979_v2 }
 0x4ee   : > { %1110 = vmax.xlane.f32.xlu0 %v3069_v33 }
 0x4ef   : > { %v1045_v51 = vpop.xlane.xlu1 %1044 }
 0x4f0   : > { %vm1070_vm7 = vcmp.eq.f32.partialorder %v2984_v4, %v1045_v51 }
 0x4f1   : > { %v3074_v35 = vsel %vm1070_vm7, -inf, %v2984_v4  ;;  %v2528_v4 = vmov 0.0  }
 0x4f2   : > { %1108 = vmax.xlane.f32.xlu1 %v3074_v35 }
 0x4f3   : > { %v1051_v53 = vpop.xlane.xlu0 %1050 }
 0x4f4   : > { %vm1073_vm8 = vcmp.eq.f32.partialorder %v2991_v6, %v1051_v53 }
 0x4f5   : > { %v3079_v54 = vsel %vm1073_vm8, -inf, %v2991_v6  ;;  %vm2527_vm8 = vmmov 0  }
 0x4f6   : > { %1114 = vmax.xlane.f32.xlu0 %v3079_v54  ;;  %2168 = vmatprep.mubr.msk.f32.mxu1 %vm2527_vm8, %v2528_v4 }
 0x4f7   : > { %v1049_v37 = vpop.xlane.xlu1 %1048  ;;  %2203 = vmatprep.mubr.msk.f32.mxu0 %vm2527_vm8, %v2528_v4  ;;  %2169 = vmatmul.mubr.f32.vlgmr.msra.gmra.mrb[0].mxu1 %v3134_v18 }
 0x4f8   : > { %vm1072_vm9 = vcmp.eq.f32.partialorder %v2996_v8, %v1049_v37  ;;  %2204 = vmatmul.mubr.f32.vlgmr.msra.gmra.mrb[16].mxu0 %v3134_v18  ;;  %2238 = vmatprep.mubr.msk.f32.mxu1 %vm2527_vm8, %v2528_v4 }
 0x4f9   : > { %v3084_v55 = vsel %vm1072_vm9, -inf, %v2996_v8  ;;  %2273 = vmatprep.mubr.msk.f32.mxu0 %vm2527_vm8, %v2528_v4 }
 0x4fa   : > { %1112 = vmax.xlane.f32.xlu1 %v3084_v55 }
 0x4ff   : > { %v1053_v41 = vpop.xlane.xlu1 %1052 }
 0x500   : > { %vm1074_vm10 = vcmp.eq.f32.partialorder %v3003_v10, %v1053_v41 }
 0x501   : > { %v3089_v56 = vsel %vm1074_vm10, -inf, %v3003_v10 }
 0x502   : > { %1116 = vmax.xlane.f32.xlu1 %v3089_v56 }
 0x503   : > { %v1055_v39 = vpop.xlane.xlu0 %1054 }
 0x504   : > { %vm1075_vm11 = vcmp.eq.f32.partialorder %v3008_v12, %v1055_v39 }
 0x505   : > { %v3094_v57 = vsel %vm1075_vm11, -inf, %v3008_v12 }
 0x506   : > { %1118 = vmax.xlane.f32.xlu0 %v3094_v57 }
 0x507   : > { %v1059_v43 = vpop.xlane.xlu0 %1058  ;;  %v1057_v45 = vpop.xlane.xlu1 %1056 }
 0x508   : > { %vm1077_vm12 = vcmp.eq.f32.partialorder %v3016_v14, %v1059_v43  ;;  %vm1076_vm13 = vcmp.eq.f32.partialorder %v3019_v38, %v1057_v45 }
 0x509   : > { %v3100_v58 = vsel %vm1077_vm12, -inf, %v3016_v14  ;;  %v3103_v59 = vsel %vm1076_vm13, -inf, %v3019_v38 }
 0x50a   : > { %1122 = vmax.xlane.f32.xlu0 %v3100_v58  ;;  %1120 = vmax.xlane.f32.xlu1 %v3103_v59 }
 0x50c   : > { %v1061_v60 = vpop.xlane.xlu1 %1060 }
 0x50d   : > { %vm1078_vm14 = vcmp.eq.f32.partialorder %v3026_v21, %v1061_v60 }
 0x50e   : > { %v3109_v62 = vsel %vm1078_vm14, -inf, %v3026_v21 }
 0x50f   : > { %1124 = vmax.xlane.f32.xlu1 %v3109_v62 }
 0x510   : > { %v1063_v0 = vpop.xlane.xlu0 %1062 }
 0x511   : > { %vm1079_vm15 = vcmp.eq.f32.partialorder %v3032_v22, %v1063_v0 }
 0x512   : > { %v3114_v3 = vsel %vm1079_vm15, -inf, %v3032_v22 }
 0x513   : > { %1126 = vmax.xlane.f32.xlu0 %v3114_v3 }
 0x563   : > { %v1099_v5 = vpop.xlane.xlu0 %1098 }
 0x564   : > { %vm1129_vm2 = vcmp.eq.f32.partialorder %v3039_v26, %v1099_v5 }
 0x565   : > { %v1145_v7 = vsel %vm1129_vm2, %v2697_v52, 128.0 }
 0x566   : > { %1162 = vmin.xlane.f32.xlu0 %v1145_v7 }
 0x567   : > { %v1097_v49 = vpop.xlane.xlu1 %1096 }
 0x568   : > { %vm1128_vm3 = vcmp.eq.f32.partialorder %v3044_v30, %v1097_v49 }
 0x569   : > { %v1144_v9 = vsel %vm1128_vm3, %v2697_v52, 128.0 }
 0x56a   : > { %1160 = vmin.xlane.f32.xlu1 %v1144_v9 }
 0x56b   : > { %v1103_v47 = vpop.xlane.xlu0 %1102 }
 0x56c   : > { %vm1131_vm4 = vcmp.eq.f32.partialorder %v3049_v25, %v1103_v47 }
 0x56d   : > { %v1147_v11 = vsel %vm1131_vm4, %v2697_v52, 128.0 }
 0x56e   : > { %1166 = vmin.xlane.f32.xlu0 %v1147_v11 }
 0x56f   : > { %v1101_v61 = vpop.xlane.xlu1 %1100 }
 0x570   : > { %vm1130_vm5 = vcmp.eq.f32.partialorder %v3054_v27, %v1101_v61 }
 0x571   : > { %v1146_v13 = vsel %vm1130_vm5, %v2697_v52, 128.0 }
 0x572   : > { %1164 = vmin.xlane.f32.xlu1 %v1146_v13 }
 0x573   : > { %v1107_v63 = vpop.xlane.xlu0 %1106 }
 0x574   : > { %vm1133_vm6 = vcmp.eq.f32.partialorder %v3059_v29, %v1107_v63 }
 0x575   : > { %v1149_v15 = vsel %vm1133_vm6, %v2697_v52, 128.0 }
 0x576   : > { %1170 = vmin.xlane.f32.xlu0 %v1149_v15 }
 0x577   : > { %v1105_v2 = vpop.xlane.xlu1 %1104 }
 0x578   : > { %vm1132_vm7 = vcmp.eq.f32.partialorder %v3064_v31, %v1105_v2 }
 0x579   : > { %v1148_v17 = vsel %vm1132_vm7, %v2697_v52, 128.0 }
 0x57a   : > { %1168 = vmin.xlane.f32.xlu1 %v1148_v17 }
 0x57b   : > { %v1111_v6 = vpop.xlane.xlu0 %1110 }
 0x57c   : > { %vm1135_vm9 = vcmp.eq.f32.partialorder %v3069_v33, %v1111_v6 }
 0x57d   : > { %v1151_v24 = vsel %vm1135_vm9, %v2697_v52, 128.0 }
 0x57e   : > { %1174 = vmin.xlane.f32.xlu0 %v1151_v24 }
 0x57f   : > { %v1109_v8 = vpop.xlane.xlu1 %1108 }
 0x580   : > { %vm1134_vm10 = vcmp.eq.f32.partialorder %v3074_v35, %v1109_v8 }
 0x581   : > { %v1150_v28 = vsel %vm1134_vm10, %v2697_v52, 128.0 }
 0x582   : > { %1172 = vmin.xlane.f32.xlu1 %v1150_v28 }
 0x583   : > { %v1115_v10 = vpop.xlane.xlu0 %1114 }
 0x584   : > { %vm1137_vm11 = vcmp.eq.f32.partialorder %v3079_v54, %v1115_v10 }
 0x585   : > { %v1153_v32 = vsel %vm1137_vm11, %v2697_v52, 128.0 }
 0x586   : > { %1178 = vmin.xlane.f32.xlu0 %v1153_v32 }
 0x587   : > { %v1113_v12 = vpop.xlane.xlu1 %1112 }
 0x588   : > { %vm1136_vm12 = vcmp.eq.f32.partialorder %v3084_v55, %v1113_v12 }
 0x589   : > { %v1152_v36 = vsel %vm1136_vm12, %v2697_v52, 128.0 }
 0x58a   : > { %1176 = vmin.xlane.f32.xlu1 %v1152_v36 }
 0x58f   : > { %v1117_v19 = vpop.xlane.xlu1 %1116 }
 0x590   : > { %vm1138_vm13 = vcmp.eq.f32.partialorder %v3089_v56, %v1117_v19 }
 0x591   : > { %v1154_v14 = vsel %vm1138_vm13, %v2697_v52, 128.0 }
 0x592   : > { %1180 = vmin.xlane.f32.xlu1 %v1154_v14 }
 0x593   : > { %v1119_v38 = vpop.xlane.xlu0 %1118 }
 0x594   : > { %vm1139_vm14 = vcmp.eq.f32.partialorder %v3094_v57, %v1119_v38 }
 0x595   : > { %v1155_v16 = vsel %vm1139_vm14, %v2697_v52, 128.0 }
 0x596   : > { %1182 = vmin.xlane.f32.xlu0 %v1155_v16 }
 0x597   : > { %v1123_v21 = vpop.xlane.xlu0 %1122  ;;  %v1121_v20 = vpop.xlane.xlu1 %1120 }
 0x598   : > { %vm1141_vm15 = vcmp.eq.f32.partialorder %v3100_v58, %v1123_v21  ;;  %vm1140_vm2 = vcmp.eq.f32.partialorder %v3103_v59, %v1121_v20 }
 0x599   : > { %v1157_v22 = vsel %vm1141_vm15, %v2697_v52, 128.0  ;;  %v1156_v40 = vsel %vm1140_vm2, %v2697_v52, 128.0 }
 0x59a   : > { %1186 = vmin.xlane.f32.xlu0 %v1157_v22  ;;  %1184 = vmin.xlane.f32.xlu1 %v1156_v40 }
 0x59c   : > { %v1125_v23 = vpop.xlane.xlu1 %1124 }
 0x59d   : > { %vm1142_vm3 = vcmp.eq.f32.partialorder %v3109_v62, %v1125_v23 }
 0x59e   : > { %v1158_v42 = vsel %vm1142_vm3, %v2697_v52, 128.0 }
 0x59f   : > { %1188 = vmin.xlane.f32.xlu1 %v1158_v42 }
 0x5a0   : > { %v1127_v44 = vpop.xlane.xlu0 %1126 }
 0x5a1   : > { %vm1143_vm4 = vcmp.eq.f32.partialorder %v3114_v3, %v1127_v44 }
 0x5a2   : > { %v1159_v46 = vsel %vm1143_vm4, %v2697_v52, 128.0 }
 0x5a3   : > { %1190 = vmin.xlane.f32.xlu0 %v1159_v46 }
 0x5f3   : > { %v1163_v48 = vpop.xlane.xlu0 %1162 }
 0x5f4   : > { %vm1193_vm5 = vcmp.eq.f32.partialorder %v2697_v52, %v1163_v48 }
 0x5f5   : > { %v3164_v50 = vsel %vm1193_vm5, -inf, %v3039_v26 }
 0x5f6   : > { %1330 = vmax.xlane.f32.xlu0 %v3164_v50 }
 0x5f7   : > { %v1161_v51 = vpop.xlane.xlu1 %1160 }
 0x5f8   : > { %vm1192_vm6 = vcmp.eq.f32.partialorder %v2697_v52, %v1161_v51 }
 0x5f9   : > { %vm2335_vm7 = vmpackc.low %vm1193_vm5, %vm1192_vm6  ;;  %v3169_v53 = vsel %vm1192_vm6, -inf, %v3044_v30 }
 0x5fa   : > { %1328 = vmax.xlane.f32.xlu1 %v3169_v53  ;;  %2336 = vmatpush3.bf16.xpose.msk.msra.mxu1 %vm2335_vm7, %v2526_v34 }
 0x5fb   : > { %v1167_v37 = vpop.xlane.xlu0 %1166  ;;  %2337 = vmatprep.subr.bf16.mxu1 %v2525_v1 }
 0x5fc   : > { %vm1195_vm9 = vcmp.eq.f32.partialorder %v2697_v52, %v1167_v37 }
 0x5fd   : > { %v3176_v26 = vsel %vm1195_vm9, -inf, %v3049_v25 }
 0x5fe   : > { %1334 = vmax.xlane.f32.xlu0 %v3176_v26 }
 0x5ff   : > { %v1165_v41 = vpop.xlane.xlu1 %1164 }
 0x600   : > { %vm1194_vm10 = vcmp.eq.f32.partialorder %v2697_v52, %v1165_v41 }
 0x601   : > { %vm2338_vm11 = vmpackc.low %vm1195_vm9, %vm1194_vm10  ;;  %v3181_v30 = vsel %vm1194_vm10, -inf, %v3054_v27 }
 0x602   : > { %1332 = vmax.xlane.f32.xlu1 %v3181_v30  ;;  %2339 = vmatpush3.bf16.xpose.msk.msra.mxu1 %vm2338_vm11, %v2526_v34 }
 0x603   : > { %v1171_v39 = vpop.xlane.xlu0 %1170  ;;  %2340 = vmatprep.subr.bf16.mxu1 %v2525_v1 }
 0x604   : > { %vm1197_vm12 = vcmp.eq.f32.partialorder %v2697_v52, %v1171_v39 }
 0x605   : > { %v3188_v25 = vsel %vm1197_vm12, -inf, %v3059_v29 }
 0x606   : > { %1338 = vmax.xlane.f32.xlu0 %v3188_v25 }
 0x607   : > { %v1169_v43 = vpop.xlane.xlu1 %1168 }
 0x608   : > { %vm1196_vm13 = vcmp.eq.f32.partialorder %v2697_v52, %v1169_v43 }
 0x609   : > { %vm2341_vm14 = vmpackc.low %vm1197_vm12, %vm1196_vm13  ;;  %v3193_v27 = vsel %vm1196_vm13, -inf, %v3064_v31 }
 0x60a   : > { %1336 = vmax.xlane.f32.xlu1 %v3193_v27  ;;  %2342 = vmatpush3.bf16.xpose.msk.msra.mxu1 %vm2341_vm14, %v2526_v34 }
 0x60b   : > { %v1175_v45 = vpop.xlane.xlu0 %1174  ;;  %2343 = vmatprep.subr.bf16.mxu1 %v2525_v1 }
 0x60c   : > { %vm1199_vm15 = vcmp.eq.f32.partialorder %v2697_v52, %v1175_v45 }
 0x60d   : > { %v3200_v29 = vsel %vm1199_vm15, -inf, %v3069_v33 }
 0x60e   : > { %1342 = vmax.xlane.f32.xlu0 %v3200_v29 }
 0x60f   : > { %v1173_v60 = vpop.xlane.xlu1 %1172 }
 0x610   : > { %vm1198_vm2 = vcmp.eq.f32.partialorder %v2697_v52, %v1173_v60 }
 0x611   : > { %vm2344_vm3 = vmpackc.low %vm1199_vm15, %vm1198_vm2  ;;  %v3205_v31 = vsel %vm1198_vm2, -inf, %v3074_v35 }
 0x612   : > { %1340 = vmax.xlane.f32.xlu1 %v3205_v31  ;;  %2345 = vmatpush3.bf16.xpose.msk.msra.mxu1 %vm2344_vm3, %v2526_v34 }
 0x613   : > { %v1179_v0 = vpop.xlane.xlu0 %1178  ;;  %2346 = vmatprep.subr.bf16.mxu1 %v2525_v1 }
 0x614   : > { %vm1201_vm4 = vcmp.eq.f32.partialorder %v2697_v52, %v1179_v0 }
 0x615   : > { %v3212_v33 = vsel %vm1201_vm4, -inf, %v3079_v54 }
 0x616   : > { %1346 = vmax.xlane.f32.xlu0 %v3212_v33 }
 0x617   : > { %v1177_v5 = vpop.xlane.xlu1 %1176 }
 0x618   : > { %vm1200_vm5 = vcmp.eq.f32.partialorder %v2697_v52, %v1177_v5 }
 0x619   : > { %vm2347_vm6 = vmpackc.low %vm1201_vm4, %vm1200_vm5  ;;  %v3217_v35 = vsel %vm1200_vm5, -inf, %v3084_v55 }
 0x61a   : > { %1344 = vmax.xlane.f32.xlu1 %v3217_v35  ;;  %2348 = vmatpush3.bf16.xpose.msk.msra.mxu1 %vm2347_vm6, %v2526_v34 }
 0x61b   : > { %2349 = vmatprep.subr.bf16.mxu1 %v2525_v1 }
 0x61f   : > { %v1181_v7 = vpop.xlane.xlu1 %1180 }
 0x620   : > { %vm1202_vm7 = vcmp.eq.f32.partialorder %v2697_v52, %v1181_v7 }
 0x621   : > { %v3224_v54 = vsel %vm1202_vm7, -inf, %v3089_v56 }
 0x622   : > { %1348 = vmax.xlane.f32.xlu1 %v3224_v54 }
 0x623   : > { %v1183_v49 = vpop.xlane.xlu0 %1182 }
 0x624   : > { %vm1203_vm9 = vcmp.eq.f32.partialorder %v2697_v52, %v1183_v49 }
 0x625   : > { %vm2350_vm10 = vmpackc.low %vm1203_vm9, %vm1202_vm7  ;;  %v3229_v55 = vsel %vm1203_vm9, -inf, %v3094_v57 }
 0x626   : > { %1350 = vmax.xlane.f32.xlu0 %v3229_v55  ;;  %2351 = vmatpush3.bf16.xpose.msk.msra.mxu1 %vm2350_vm10, %v2526_v34 }
 0x627   : > { %v1187_v9 = vpop.xlane.xlu0 %1186  ;;  %v1185_v47 = vpop.xlane.xlu1 %1184  ;;  %2352 = vmatprep.subr.bf16.mxu1 %v2525_v1 }
 0x628   : > { %vm1205_vm11 = vcmp.eq.f32.partialorder %v2697_v52, %v1187_v9  ;;  %vm1204_vm12 = vcmp.eq.f32.partialorder %v2697_v52, %v1185_v47 }
 0x629   : > { %v3237_v56 = vsel %vm1205_vm11, -inf, %v3100_v58  ;;  %v3240_v11 = vsel %vm1204_vm12, -inf, %v3103_v59  ;;  %vm2353_vm13 = vmpackc.low %vm1205_vm11, %vm1204_vm12 }
 0x62a   : > { %1354 = vmax.xlane.f32.xlu0 %v3237_v56  ;;  %1352 = vmax.xlane.f32.xlu1 %v3240_v11 }
 0x62c   : > { %v1189_v57 = vpop.xlane.xlu1 %1188 }
 0x62d   : > { %vm1206_vm14 = vcmp.eq.f32.partialorder %v2697_v52, %v1189_v57 }
 0x62e   : > { %v3246_v61 = vsel %vm1206_vm14, -inf, %v3109_v62  ;;  %2354 = vmatpush3.bf16.xpose.msk.msra.mxu1 %vm2353_vm13, %v2526_v34 }
 0x62f   : > { %1356 = vmax.xlane.f32.xlu1 %v3246_v61  ;;  %2355 = vmatprep.subr.bf16.mxu1 %v2525_v1 }
 0x630   : > { %v1191_v58 = vpop.xlane.xlu0 %1190 }
 0x631   : > { %vm1207_vm15 = vcmp.eq.f32.partialorder %v2697_v52, %v1191_v58 }
 0x632   : > { %v3253_v59 = vsel %vm1207_vm15, -inf, %v3114_v3  ;;  %vm2356_vm2 = vmpackc.low %vm1207_vm15, %vm1206_vm14 }
 0x633   : > { %1358 = vmax.xlane.f32.xlu0 %v3253_v59 }
 0x636   : > { %2357 = vmatpush3.bf16.xpose.msk.msra.mxu1 %vm2356_vm2, %v2526_v34 }
 0x637   : > { %2276 = vmatprep.subr.mxu1 %v2528_v4 }
 0x63d   : > { %2239 = vmatmul.mubr.f32.vlgmr.msra.gmra.mrb[2].mxu1 %v3134_v18 }
 0x63e   : > { %2278 = vmatprep.mubr.msk.f32.mxu1 %vm2527_vm8, %v2528_v4 }
 0x683   : > { %v1331_v62 = vpop.xlane.xlu0 %1330 }
 0x684   : > { %vm1361_vm3 = vcmp.eq.f32.partialorder %v3164_v50, %v1331_v62 }
 0x685   : > { %v3263_v13 = vsel %vm1361_vm3, -inf, %v3164_v50 }
 0x686   : > { %1394 = vmax.xlane.f32.xlu0 %v3263_v13 }
 0x687   : > { %v1329_v3 = vpop.xlane.xlu1 %1328 }
 0x688   : > { %vm1360_vm4 = vcmp.eq.f32.partialorder %v3169_v53, %v1329_v3 }
 0x689   : > { %v3268_v63 = vsel %vm1360_vm4, -inf, %v3169_v53 }
 0x68a   : > { %1392 = vmax.xlane.f32.xlu1 %v3268_v63 }
 0x68b   : > { %v1335_v15 = vpop.xlane.xlu0 %1334 }
 0x68c   : > { %vm1363_vm5 = vcmp.eq.f32.partialorder %v3176_v26, %v1335_v15 }
 0x68d   : > { %v3273_v2 = vsel %vm1363_vm5, -inf, %v3176_v26 }
 0x68e   : > { %1398 = vmax.xlane.f32.xlu0 %v3273_v2 }
 0x68f   : > { %v1333_v17 = vpop.xlane.xlu1 %1332 }
 0x690   : > { %vm1362_vm6 = vcmp.eq.f32.partialorder %v3181_v30, %v1333_v17  ;;  %v1010_v17 = vpop.f32.mrb[16].mxu0 }
 0x691   : > { %v3278_v6 = vsel %vm1362_vm6, -inf, %v3181_v30 }
 0x692   : > { %1396 = vmax.xlane.f32.xlu1 %v3278_v6 }
 0x693   : > { %v1339_v24 = vpop.xlane.xlu0 %1338 }
 0x694   : > { %vm1365_vm7 = vcmp.eq.f32.partialorder %v3188_v25, %v1339_v24 }
 0x695   : > { %v3283_v8 = vsel %vm1365_vm7, -inf, %v3188_v25 }
 0x696   : > { %1402 = vmax.xlane.f32.xlu0 %v3283_v8 }
 0x697   : > { %v1337_v28 = vpop.xlane.xlu1 %1336 }
 0x698   : > { %vm1364_vm9 = vcmp.eq.f32.partialorder %v3193_v27, %v1337_v28  ;;  %v2205_v28 = vpop.f32.mrb[17].mxu0 }
 0x699   : > { %v3288_v10 = vsel %vm1364_vm9, -inf, %v3193_v27 }
 0x69a   : > { %1400 = vmax.xlane.f32.xlu1 %v3288_v10 }
 0x69b   : > { %v1343_v32 = vpop.xlane.xlu0 %1342 }
 0x69c   : > { %vm1367_vm10 = vcmp.eq.f32.partialorder %v3200_v29, %v1343_v32 }
 0x69d   : > { %v3293_v12 = vsel %vm1367_vm10, -inf, %v3200_v29 }
 0x69e   : > { %1406 = vmax.xlane.f32.xlu0 %v3293_v12 }
 0x69f   : > { %v1341_v36 = vpop.xlane.xlu1 %1340 }
 0x6a0   : > { %vm1366_vm11 = vcmp.eq.f32.partialorder %v3205_v31, %v1341_v36 }
 0x6a1   : > { %v3298_v19 = vsel %vm1366_vm11, -inf, %v3205_v31 }
 0x6a2   : > { %1404 = vmax.xlane.f32.xlu1 %v3298_v19 }
 0x6a3   : > { %v1347_v14 = vpop.xlane.xlu0 %1346 }
 0x6a4   : > { %vm1369_vm12 = vcmp.eq.f32.partialorder %v3212_v33, %v1347_v14 }
 0x6a5   : > { %v3303_v38 = vsel %vm1369_vm12, -inf, %v3212_v33 }
 0x6a6   : > { %1410 = vmax.xlane.f32.xlu0 %v3303_v38 }
 0x6a7   : > { %v1345_v16 = vpop.xlane.xlu1 %1344 }
 0x6a8   : > { %vm1368_vm13 = vcmp.eq.f32.partialorder %v3217_v35, %v1345_v16 }
 0x6a9   : > { %v3308_v21 = vsel %vm1368_vm13, -inf, %v3217_v35 }
 0x6aa   : > { %1408 = vmax.xlane.f32.xlu1 %v3308_v21 }
 0x6af   : > { %v1349_v20 = vpop.xlane.xlu1 %1348 }
 0x6b0   : > { %vm1370_vm14 = vcmp.eq.f32.partialorder %v3224_v54, %v1349_v20 }
 0x6b1   : > { %v3313_v22 = vsel %vm1370_vm14, -inf, %v3224_v54 }
 0x6b2   : > { %1412 = vmax.xlane.f32.xlu1 %v3313_v22 }
 0x6b3   : > { %v1351_v40 = vpop.xlane.xlu0 %1350 }
 0x6b4   : > { %vm1371_vm15 = vcmp.eq.f32.partialorder %v3229_v55, %v1351_v40 }
 0x6b5   : > { %v3318_v23 = vsel %vm1371_vm15, -inf, %v3229_v55 }
 0x6b6   : > { %1414 = vmax.xlane.f32.xlu0 %v3318_v23 }
 0x6b7   : > { %v1355_v42 = vpop.xlane.xlu0 %1354  ;;  %v1353_v44 = vpop.xlane.xlu1 %1352 }
 0x6b8   : > { %vm1373_vm2 = vcmp.eq.f32.partialorder %v3237_v56, %v1355_v42  ;;  %vm1372_vm3 = vcmp.eq.f32.partialorder %v3240_v11, %v1353_v44 }
 0x6b9   : > { %v3324_v46 = vsel %vm1373_vm2, -inf, %v3237_v56  ;;  %v3327_v48 = vsel %vm1372_vm3, -inf, %v3240_v11 }
 0x6ba   : > { %1418 = vmax.xlane.f32.xlu0 %v3324_v46  ;;  %1416 = vmax.xlane.f32.xlu1 %v3327_v48 }
 0x6bc   : > { %v1357_v50 = vpop.xlane.xlu1 %1356 }
 0x6bd   : > { %vm1374_vm4 = vcmp.eq.f32.partialorder %v3246_v61, %v1357_v50 }
 0x6be   : > { %v3333_v51 = vsel %vm1374_vm4, -inf, %v3246_v61 }
 0x6bf   : > { %1420 = vmax.xlane.f32.xlu1 %v3333_v51 }
 0x6c0   : > { %v1359_v53 = vpop.xlane.xlu0 %1358 }
 0x6c1   : > { %vm1375_vm5 = vcmp.eq.f32.partialorder %v3253_v59, %v1359_v53 }
 0x6c2   : > { %v3338_v37 = vsel %vm1375_vm5, -inf, %v3253_v59 }
 0x6c3   : > { %1422 = vmax.xlane.f32.xlu0 %v3338_v37 }
 0x713   : > { %v1395_v26 = vpop.xlane.xlu0 %1394 }
 0x714   : > { %vm1425_vm6 = vcmp.eq.f32.partialorder %v3263_v13, %v1395_v26 }
 0x715   : > { %v1441_v41 = vsel %vm1425_vm6, %v2697_v52, 128.0 }
 0x716   : > { %1458 = vmin.xlane.f32.xlu0 %v1441_v41 }
 0x717   : > { %v1393_v30 = vpop.xlane.xlu1 %1392 }
 0x718   : > { %vm1424_vm7 = vcmp.eq.f32.partialorder %v3268_v63, %v1393_v30 }
 0x719   : > { %v1440_v39 = vsel %vm1424_vm7, %v2697_v52, 128.0 }
 0x71a   : > { %1456 = vmin.xlane.f32.xlu1 %v1440_v39  ;;  %v1609_v39 = vld [vmem:[%s3484_s3] sm:$0xff] }
 0x71b   : > { %v1399_v25 = vpop.xlane.xlu0 %1398 }
 0x71c   : > { %vm1427_vm9 = vcmp.eq.f32.partialorder %v3273_v2, %v1399_v25  ;;  %v715_v2 = vpop.f32.mrb[0].mxu1 }
 0x71d   : > { %v1443_v43 = vsel %vm1427_vm9, %v2697_v52, 128.0  ;;  %v2170_v24 = vpop.f32.mrb[1].mxu1 }
 0x71e   : > { %1462 = vmin.xlane.f32.xlu0 %v1443_v43 }
 0x71f   : > { %v1397_v27 = vpop.xlane.xlu1 %1396 }
 0x720   : > { %vm1426_vm10 = vcmp.eq.f32.partialorder %v3278_v6, %v1397_v27  ;;  %v719_v6 = vsub.f32 %v715_v2, %v3134_v18 }
 0x721   : > { %v1442_v45 = vsel %vm1426_vm10, %v2697_v52, 128.0 }
 0x722   : > { %1460 = vmin.xlane.f32.xlu1 %v1442_v45 }
 0x723   : > { %v1403_v29 = vpop.xlane.xlu0 %1402 }
 0x724   : > { %vm1429_vm11 = vcmp.eq.f32.partialorder %v3283_v8, %v1403_v29  ;;  %v1014_v8 = vsub.f32 %v1010_v17, %v3134_v18 }
 0x725   : > { %v1445_v60 = vsel %vm1429_vm11, %v2697_v52, 128.0 }
 0x726   : > { %1466 = vmin.xlane.f32.xlu0 %v1445_v60  ;;  %v1015_v32 = vmax.f32 %v719_v6, %v1014_v8 }
 0x727   : > { %v1401_v31 = vpop.xlane.xlu1 %1400 }
 0x728   : > { %vm1428_vm12 = vcmp.eq.f32.partialorder %v3288_v10, %v1401_v31  ;;  %v1306_v10 = vpop.f32.mrb[2].mxu1 }
 0x729   : > { %v1444_v0 = vsel %vm1428_vm12, %v2697_v52, 128.0  ;;  %v2240_v36 = vpop.f32.mrb[3].mxu1 }
 0x72a   : > { %1464 = vmin.xlane.f32.xlu1 %v1444_v0 }
 0x72b   : > { %v1407_v33 = vpop.xlane.xlu0 %1406 }
 0x72c   : > { %vm1431_vm13 = vcmp.eq.f32.partialorder %v3293_v12, %v1407_v33  ;;  %v1310_v12 = vsub.f32 %v1306_v10, %v3134_v18 }
 0x72d   : > { %v1447_v5 = vsel %vm1431_vm13, %v2697_v52, 128.0 }
 0x72e   : > { %1470 = vmin.xlane.f32.xlu0 %v1447_v5 }
 0x72f   : > { %v1405_v35 = vpop.xlane.xlu1 %1404 }
 0x730   : > { %vm1430_vm14 = vcmp.eq.f32.partialorder %v3298_v19, %v1405_v35  ;;  %v3376_v19 = vmax.f32 %v1015_v32, %v1310_v12 }
 0x731   : > { %v1446_v7 = vsel %vm1430_vm14, %v2697_v52, 128.0 }
 0x732   : > { %1468 = vmin.xlane.f32.xlu1 %v1446_v7 }
 0x733   : > { %v1411_v54 = vpop.xlane.xlu0 %1410 }
 0x734   : > { %vm1433_vm15 = vcmp.eq.f32.partialorder %v3303_v38, %v1411_v54 }
 0x735   : > { %v1449_v49 = vsel %vm1433_vm15, %v2697_v52, 128.0 }
 0x736   : > { %1474 = vmin.xlane.f32.xlu0 %v1449_v49 }
 0x737   : > { %v1409_v55 = vpop.xlane.xlu1 %1408 }
 0x738   : > { %vm1432_vm2 = vcmp.eq.f32.partialorder %v3308_v21, %v1409_v55 }
 0x739   : > { %v1448_v9 = vsel %vm1432_vm2, %v2697_v52, 128.0 }
 0x73a   : > { %1472 = vmin.xlane.f32.xlu1 %v1448_v9 }
 0x73f   : > { %v1413_v47 = vpop.xlane.xlu1 %1412 }
 0x740   : > { %vm1434_vm3 = vcmp.eq.f32.partialorder %v3313_v22, %v1413_v47 }
 0x741   : > { %v1450_v56 = vsel %vm1434_vm3, %v2697_v52, 128.0 }
 0x742   : > { %1476 = vmin.xlane.f32.xlu1 %v1450_v56 }
 0x743   : > { %v1415_v11 = vpop.xlane.xlu0 %1414 }
 0x744   : > { %vm1435_vm4 = vcmp.eq.f32.partialorder %v3318_v23, %v1415_v11 }
 0x745   : > { %v1451_v57 = vsel %vm1435_vm4, %v2697_v52, 128.0 }
 0x746   : > { %1478 = vmin.xlane.f32.xlu0 %v1451_v57 }
 0x747   : > { %v1419_v61 = vpop.xlane.xlu0 %1418  ;;  %v1417_v58 = vpop.xlane.xlu1 %1416 }
 0x748   : > { %vm1437_vm5 = vcmp.eq.f32.partialorder %v3324_v46, %v1419_v61  ;;  %vm1436_vm6 = vcmp.eq.f32.partialorder %v3327_v48, %v1417_v58 }
 0x749   : > { %v1453_v59 = vsel %vm1437_vm5, %v2697_v52, 128.0  ;;  %v1452_v62 = vsel %vm1436_vm6, %v2697_v52, 128.0 }
 0x74a   : > { %1482 = vmin.xlane.f32.xlu0 %v1453_v59  ;;  %1480 = vmin.xlane.f32.xlu1 %v1452_v62 }
 0x74c   : > { %v1421_v13 = vpop.xlane.xlu1 %1420 }
 0x74d   : > { %vm1438_vm7 = vcmp.eq.f32.partialorder %v3333_v51, %v1421_v13 }
 0x74e   : > { %v1454_v3 = vsel %vm1438_vm7, %v2697_v52, 128.0 }
 0x74f   : > { %1484 = vmin.xlane.f32.xlu1 %v1454_v3 }
 0x750   : > { %v1423_v63 = vpop.xlane.xlu0 %1422 }
 0x751   : > { %vm1439_vm9 = vcmp.eq.f32.partialorder %v3338_v37, %v1423_v63 }
 0x752   : > { %v1455_v15 = vsel %vm1439_vm9, %v2697_v52, 128.0 }
 0x753   : > { %1486 = vmin.xlane.f32.xlu0 %v1455_v15 }
 0x7a3   : > { %v1459_v14 = vpop.xlane.xlu0 %1458 }
 0x7a4   : > { %vm1489_vm10 = vcmp.eq.f32.partialorder %v2697_v52, %v1459_v14 }
 0x7a7   : > { %v1457_v38 = vpop.xlane.xlu1 %1456 }
 0x7a8   : > { %vm1488_vm11 = vcmp.eq.f32.partialorder %v2697_v52, %v1457_v38 }
 0x7a9   : > { %vm2359_vm12 = vmpackc.low %vm1489_vm10, %vm1488_vm11 }
 0x7aa   : > { %2360 = vmatpush3.bf16.xpose.msk.msra.mxu0 %vm2359_vm12, %v2526_v34 }
 0x7ab   : > { %2361 = vmatprep.subr.bf16.mxu0 %v2525_v1  ;;  %v1463_v16 = vpop.xlane.xlu0 %1462 }
 0x7ac   : > { %vm1491_vm13 = vcmp.eq.f32.partialorder %v2697_v52, %v1463_v16 }
 0x7af   : > { %v1461_v21 = vpop.xlane.xlu1 %1460 }
 0x7b0   : > { %vm1490_vm14 = vcmp.eq.f32.partialorder %v2697_v52, %v1461_v21 }
 0x7b1   : > { %vm2362_vm15 = vmpackc.low %vm1491_vm13, %vm1490_vm14 }
 0x7b2   : > { %2363 = vmatpush3.bf16.xpose.msk.msra.mxu0 %vm2362_vm15, %v2526_v34 }
 0x7b3   : > { %2364 = vmatprep.subr.bf16.mxu0 %v2525_v1  ;;  %v1467_v20 = vpop.xlane.xlu0 %1466 }
 0x7b4   : > { %vm1493_vm2 = vcmp.eq.f32.partialorder %v2697_v52, %v1467_v20 }
 0x7b7   : > { %v1465_v22 = vpop.xlane.xlu1 %1464 }
 0x7b8   : > { %vm1492_vm3 = vcmp.eq.f32.partialorder %v2697_v52, %v1465_v22 }
 0x7b9   : > { %vm2365_vm4 = vmpackc.low %vm1493_vm2, %vm1492_vm3 }
 0x7ba   : > { %2366 = vmatpush3.bf16.xpose.msk.msra.mxu0 %vm2365_vm4, %v2526_v34 }
 0x7bb   : > { %2367 = vmatprep.subr.bf16.mxu0 %v2525_v1  ;;  %v1471_v40 = vpop.xlane.xlu0 %1470 }
 0x7bc   : > { %vm1495_vm5 = vcmp.eq.f32.partialorder %v2697_v52, %v1471_v40 }
 0x7bf   : > { %v1469_v23 = vpop.xlane.xlu1 %1468 }
 0x7c0   : > { %vm1494_vm6 = vcmp.eq.f32.partialorder %v2697_v52, %v1469_v23 }
 0x7c1   : > { %vm2368_vm7 = vmpackc.low %vm1495_vm5, %vm1494_vm6 }
 0x7c2   : > { %2369 = vmatpush3.bf16.xpose.msk.msra.mxu0 %vm2368_vm7, %v2526_v34 }
 0x7c3   : > { %2370 = vmatprep.subr.bf16.mxu0 %v2525_v1  ;;  %v1475_v42 = vpop.xlane.xlu0 %1474 }
 0x7c4   : > { %vm1497_vm9 = vcmp.eq.f32.partialorder %v2697_v52, %v1475_v42 }
 0x7c7   : > { %v1473_v44 = vpop.xlane.xlu1 %1472 }
 0x7c8   : > { %vm1496_vm10 = vcmp.eq.f32.partialorder %v2697_v52, %v1473_v44 }
 0x7c9   : > { %vm2371_vm11 = vmpackc.low %vm1497_vm9, %vm1496_vm10 }
 0x7ca   : > { %2372 = vmatpush3.bf16.xpose.msk.msra.mxu0 %vm2371_vm11, %v2526_v34 }
 0x7cb   : > { %2373 = vmatprep.subr.bf16.mxu0 %v2525_v1 }
 0x7cf   : > { %v1477_v46 = vpop.xlane.xlu1 %1476 }
 0x7d0   : > { %vm1498_vm12 = vcmp.eq.f32.partialorder %v2697_v52, %v1477_v46 }
 0x7d3   : > { %v1479_v48 = vpop.xlane.xlu0 %1478 }
 0x7d4   : > { %vm1499_vm13 = vcmp.eq.f32.partialorder %v2697_v52, %v1479_v48 }
 0x7d5   : > { %vm2374_vm14 = vmpackc.low %vm1499_vm13, %vm1498_vm12 }
 0x7d6   : > { %2375 = vmatpush3.bf16.xpose.msk.msra.mxu0 %vm2374_vm14, %v2526_v34 }
 0x7d7   : > { %v1483_v50 = vpop.xlane.xlu0 %1482  ;;  %v1481_v51 = vpop.xlane.xlu1 %1480  ;;  %2376 = vmatprep.subr.bf16.mxu0 %v2525_v1 }
 0x7d8   : > { %vm1501_vm15 = vcmp.eq.f32.partialorder %v2697_v52, %v1483_v50  ;;  %vm1500_vm2 = vcmp.eq.f32.partialorder %v2697_v52, %v1481_v51 }
 0x7d9   : > { %vm2377_vm3 = vmpackc.low %vm1501_vm15, %vm1500_vm2 }
 0x7dc   : > { %v1485_v37 = vpop.xlane.xlu1 %1484 }
 0x7dd   : > { %vm1502_vm5 = vcmp.eq.f32.partialorder %v2697_v52, %v1485_v37 }
 0x7de   : > { %2378 = vmatpush3.bf16.xpose.msk.msra.mxu0 %vm2377_vm3, %v2526_v34 }
 0x7df   : > { %2379 = vmatprep.subr.bf16.mxu0 %v2525_v1  ;;  %v1608_v1 = vld [vmem:[%s3483_s2] sm:$0xff] }
 0x7e0   : > { %v1487_v53 = vpop.xlane.xlu0 %1486 }
 0x7e1   : > { %vm1503_vm4 = vcmp.eq.f32.partialorder %v2697_v52, %v1487_v53  ;;  %v1759_v52 = vld [vmem:[%s3485_s4] sm:$0xff] }
 0x7e2   : > { %vm2380_vm6 = vmpackc.low %vm1503_vm4, %vm1502_vm5 }
 0x7e6   : > { %2381 = vmatpush3.bf16.xpose.msk.msra.mxu0 %vm2380_vm6, %v2526_v34  ;;  %v2529_v34 = vmov 0  }
 0x7e7   : > { %2281 = vmatprep.subr.mxu0 %v2528_v4  ;;  %2442 = vset.pattern.permute.xlu1 %v2529_v34 }
 0x7e8   : > { %2443 = vset.pattern.permute.xlu0 %v2529_v34  ;;  %1762 = vperm.xlu1 %2442, %v1759_v52  }
 0x7ed   : > { %2274 = vmatmul.mubr.f32.vlgmr.msra.gmra.mrb[18].mxu0 %v3134_v18 }
 0x7ee   : > { %2282 = vmatpush3.msk.msra.mxu0 %vm330_vm0, %v3134_v18  ;;  %2283 = vmatprep.mubr.msk.f32.mxu0 %vm2527_vm8, %v2528_v4 }
 0x7f1   : > { %2284 = vmatmul.mubr.msk.f32.vlgmr.msra.gmra.mrb[20].mxu0 %vm281_vm1, %v1608_v1 }
 0x867   : > { %v1763_v45 = vpop.permute.xlu1 %1762 }
 0x8c0   : > { %v1602_v26 = vpop.f32.mrb[18].mxu0 }
 0x8c1   : > { %v1606_v41 = vsub.f32 %v1602_v26, %v3134_v18  ;;  %v2275_v4 = vpop.f32.mrb[19].mxu0 }
 0x8c3   : > { %v1607_v30 = vmax.f32 %v3376_v19, %v1606_v41 }
 0x8c4   : > { %v1755_v25 = vpop.f32.mrb[20].mxu0 }
 0x8c5   : > { %2277 = vmatpush3.msk.msra.mxu1 %vm330_vm0, %v1607_v30  ;;  %v2285_v43 = vpop.f32.mrb[21].mxu0 }
 0x8c6   : > { %2279 = vmatmul.mubr.msk.f32.vlgmr.msra.gmra.mrb[4].mxu1 %vm281_vm1, %v1609_v39 }
 0x999   : > { %v1682_v27 = vpop.f32.mrb[4].mxu1 }
 0x99a   : > { %v1756_v29 = vadd.f32 %v1755_v25, %v1682_v27  ;;  %v2280_v18 = vpop.f32.mrb[5].mxu1 }
 0x99c   : > { %v1765_v60 = vadd.f32 %v1763_v45, %v1756_v29 }
 0x99e   : > { %v1766_v31 = vmax.f32 %v1765_v60, 0.0 }
 0x9a0   : > { %1767 = vst [vmem:[%s240_s9] sm:$0xff] %v1766_v31 }
 0x9a1   : > { %2458 = shalt.err (!%p2455_p5)
}
 0x9a2   : > { %s2459_s24 = scalar_lea.hbm %s3434_s13, 128  ;;  %s2463_s29 = scalar_lea.hbm %s3486_s5, 256 }
 0x9a3   : > { %p2460_p6 = scmp.ne.s32.totalorder %s3434_s13, %s2459_s24  ;;  %p2464_p10 = scmp.lt.u32.totalorder %s3434_s13, %s3486_s5 }
 0x9a4   : > { %p2465_p11 = scmp.lt.u32.totalorder %s2463_s29, %s2459_s24  ;;  %p2467_p13 = scmp.lt.u32.totalorder %s2459_s24, %s3434_s13 }
 0x9a5   : > { %p2461_p7 = pnand %p2460_p6, %p2601_p4 }
 0x9a6   : > { %p2466_p12 = por %p2465_p11, %p2464_p10 }
 0x9a7   : > { %p2462_p9 = pneg %p2461_p7 }
 0x9a8   : > { %p2468_p0 = por %p2467_p13, %p2466_p12 }
 0x9aa   : > { %p2469_p1 = pnand %p2468_p0, %p2462_p9 }
 0x9ac   : > { %2472 = shalt.err (!%p2469_p1)
}
 0x9ad   : > { %2382 = dma.vmem_to_hbm [thread:$0]  (%p2601_p4), %s3436_s10, 128, %s3434_s13, %s1769_s14  }
 0x9ae PF: > { %p2388_p2 = scmp.ge.s32.totalorder %s2523_s23, 2  ;;  %s1795_s9 = sand.u32 1, %s2503_s18  }
 0x9af   : > { %s1796_s11 = scalar_lea.sflag [#allocation3], %s1795_s9 }
 0x9b0   : > { %p2385_p3 = pnand %p2388_p2, %p2608_p8 }
 0x9b2   : > { %2498 = dma.done.wait (!%p2385_p3), %s1796_s11, 128  }
 0x9b3   : > { %2500 = vsyncadd (!%p2385_p3), %s1796_s11, 4294967168  ;;  %s18_s23 = sadd.s32 1, %s2523_s23   ;;  %s3489_s18 = smov %s2507_s19 }
 0x9b4   : > { %p15_p5 = scmp.ge.s32.totalorder %s18_s23, 4   ;;  %s3490_s19 = smov %s2511_s20 }
 0x9b5   : > { %s3491_s20 = smov %s2614_s6  ;;  %s3492_s21 = smov %s2519_s22 }
 0x9b6   : > { %s3493_s22 = smov %s3495_s26  ;;  %17 = sbr.rel (!%p15_p5) target bundleno = 4 (0x4), region = 78 }
 0x9bd   :  { %1801 = vsyncpa [#allocation3], 1 }
 0x9be   :  { %1803 = vsyncpa [#allocation3 + $0x1], 1 }

</bundles_post_ra>
